<compile_context>
chip_gen: v5e
topology: v5e:2x2
jax: 0.10.0
libtpu: 0.0.40
codegen_flags: <defaults>
</compile_context>

<pallas_src>
import functools
import math

import jax
import jax.numpy as jnp
from jax import lax
from jax.experimental import pallas as pl
from jax.experimental.pallas import tpu as pltpu  # noqa: F401  (kept for TPU-specific params if scaled up)

# ---------------- model hyper-parameters (small synthetic config) -----------
HIDDEN = 32            # transformer.d_model
NUM_CLASSES = 16
NUM_QUERIES = 8
NUM_DEC_LAYERS = 3     # transformer.decoder.num_layers
NUM_FEATURE_LEVELS = 2
GN_EPS = 1e-5          # nn.GroupNorm default eps
# GroupNorm(32, HIDDEN) with HIDDEN == 32 -> group size 1 (per-channel norm).
assert HIDDEN == 32, "kernel assumes GroupNorm group size 1 (32 groups, 32 ch)"

FUSED_W = HIDDEN + NUM_CLASSES + 1   # fused [bbox-l1 | class | obj] weight width
OUT_PAD_W = 128                      # lane-dense output slab width (>= 21)


# ============================================================================
# Kernel 1: input_proj for ALL levels in one gridless launch.
#   level l: Conv2d(Cin_l, HIDDEN, k=1) + GroupNorm(32, HIDDEN)
#   x arrives pre-reshaped (B*HW, Cin) from the wrapper (no in-kernel reshape).
# ============================================================================
def _input_proj_kernel(*refs, num_levels):
    in_refs = refs[:5 * num_levels]
    out_refs = refs[5 * num_levels:]
    for lvl in range(num_levels):
        x_ref, w_ref, b_ref, g_ref, beta_ref = in_refs[5 * lvl:5 * (lvl + 1)]
        o_ref = out_refs[lvl]
        nb, hw, cout = o_ref.shape
        # 1x1 conv == matmul over the whole batch; bf16 operands, f32 accum.
        y_all = jnp.dot(x_ref[...], w_ref[...],
                        preferred_element_type=jnp.float32) + b_ref[...]
        # Hoist affine-parameter broadcasts out of the per-sample loop.
        g = jnp.broadcast_to(g_ref[...], (hw, cout))
        bt = jnp.broadcast_to(beta_ref[...], (hw, cout))
        # GroupNorm with group size 1: per-sample, per-channel stats over HW.
        # TODO(synk): at real Deformable-DETR sizes (Cin up to 2048, HW ~10k)
        # this must be HW-tiled with an accumulated two-pass GroupNorm (and an
        # explicit vmem_limit_bytes) to fit v7x's 64 MiB VMEM.
        for i in range(nb):                         # nb tiny -> static unroll
            y = y_all[i * hw:(i + 1) * hw]          # static, sublane-aligned
            mean = jnp.mean(y, axis=0, keepdims=True)
            var = jnp.mean(jnp.square(y - mean), axis=0, keepdims=True)
            o_ref[i] = (y - mean) * lax.rsqrt(var + GN_EPS) * g + bt


def input_proj_all_levels(features, proj_params):
    """features: list of (B, Cin_l, H_l, W_l) -> list of (B, H_l*W_l, HIDDEN)."""
    num_levels = len(features)
    args = []
    out_shapes = []
    for feat, pp in zip(features, proj_params):
        B, cin, H, W = feat.shape
        hw = H * W
        # One transpose into channels-last + collapse batch/space in XLA (not
        # inside the kernel), cast to bf16 for the MXU.
        x = jnp.transpose(feat, (0, 2, 3, 1)).reshape(B * hw, cin)
        args += [x.astype(jnp.bfloat16),
                 pp["w"].astype(jnp.bfloat16),
                 pp["b"].reshape(1, HIDDEN),
                 pp["gamma"].reshape(1, HIDDEN),
                 pp["beta"].reshape(1, HIDDEN)]
        out_shapes.append(jax.ShapeDtypeStruct((B, hw, HIDDEN), jnp.float32))
    outs = pl.pallas_call(
        functools.partial(_input_proj_kernel, num_levels=num_levels),
        out_shape=tuple(out_shapes),
    )(*args)
    return list(outs)                                # each (B, HW_l, HIDDEN)


# ============================================================================
# Kernel 2: fused prediction heads for ALL decoder levels in ONE gridless
# launch (L folded into the matmul M dimension).
#   fused matmul: hs @ [w1 | wc | wo]  ->  [bbox-h1 | logits | obj-pre]
#   then bbox layers 2/3, inverse_sigmoid(reference) add, sigmoids, and
#   direct slice stores into a lane-dense 128-wide output slab.
# ============================================================================
def _head_kernel(hs_ref, ref_ref,
                 wcf_ref, bcf_ref, w2_ref, b2_ref, w3_ref, b3_ref,
                 out_ref, *, ref_dim):
    hs = hs_ref[...]                                         # (M, H) bf16

    # One MXU pass for [bbox-MLP layer1 | class_embed | object_head].
    fused = jnp.dot(hs, wcf_ref[...],
                    preferred_element_type=jnp.float32) + bcf_ref[...]
    h1 = jnp.maximum(fused[:, :HIDDEN], 0.0)                 # (M, H)
    logits = fused[:, HIDDEN:HIDDEN + NUM_CLASSES]           # (M, NC)
    obj = jax.nn.sigmoid(
        fused[:, HIDDEN + NUM_CLASSES:HIDDEN + NUM_CLASSES + 1])   # (M, 1)

    # bbox_embed layers 2 & 3 (ReLU on all but last layer).
    h2 = jnp.maximum(
        jnp.dot(h1.astype(jnp.bfloat16), w2_ref[...],
                preferred_element_type=jnp.float32) + b2_ref[...], 0.0)
    tmp = jnp.dot(h2.astype(jnp.bfloat16), w3_ref[...],
                  preferred_element_type=jnp.float32) + b3_ref[...]  # (M, 4)

    # inverse_sigmoid(reference)  (eps = 1e-5, as in the reference repo);
    # only the first ref_dim columns of the zero-padded reference are added.
    r = jnp.clip(ref_ref[...], 0.0, 1.0)                     # (M, 4)
    inv = jnp.log(jnp.maximum(r, 1e-5) / jnp.maximum(1.0 - r, 1e-5))
    col = lax.broadcasted_iota(jnp.int32, tmp.shape, 1)
    coord = jax.nn.sigmoid(tmp + jnp.where(col < ref_dim, inv, 0.0))

    # Lane-dense 128-wide output slab; direct slice stores (no lane concat).
    out_ref[...] = jnp.zeros_like(out_ref)
    out_ref[:, 0:NUM_CLASSES] = logits
    out_ref[:, NUM_CLASSES:NUM_CLASSES + 4] = coord
    out_ref[:, NUM_CLASSES + 4:NUM_CLASSES + 5] = obj


def detr_heads_all_levels(hs, references, head_params):
    """hs: (L, B, Q, H); references: (L, B, Q, 2 or 4)."""
    L, B, Q, H = hs.shape
    rd = references.shape[-1]
    assert rd in (2, 4)
    M = L * B * Q
    hs2 = hs.reshape(M, H).astype(jnp.bfloat16)
    ref2 = references.reshape(M, rd)
    if rd < 4:
        ref2 = jnp.pad(ref2, ((0, 0), (0, 4 - rd)))

    wcf, bcf, w2, b2, w3, b3 = head_params
    slab = pl.pallas_call(
        functools.partial(_head_kernel, ref_dim=rd),
        out_shape=jax.ShapeDtypeStruct((M, OUT_PAD_W), jnp.float32),
    )(hs2, ref2, wcf, bcf, w2, b2, w3, b3)

    slab = slab.reshape(L, B, Q, OUT_PAD_W)
    logits = slab[..., :NUM_CLASSES]
    coord = slab[..., NUM_CLASSES:NUM_CLASSES + 4]
    obj = slab[..., NUM_CLASSES + 4:NUM_CLASSES + 5]
    return logits, coord, obj                                # each (L, B, Q, .)


# ============================================================================
# Deterministic parameter construction (mirrors DeformableDETR.__init__)
# ============================================================================
def make_params(backbone_channels):
    key = jax.random.PRNGKey(1)
    ks = iter(jax.random.split(key, 16))
    p = {}

    # input_proj: Conv2d(Cin, HIDDEN, 1) (xavier_uniform weight, zero bias)
    # + GroupNorm(32, HIDDEN) (gamma=1, beta=0)
    p["input_proj"] = []
    for cin in backbone_channels:
        bound = math.sqrt(6.0 / (cin + HIDDEN))
        w = jax.random.uniform(next(ks), (cin, HIDDEN),
                               minval=-bound, maxval=bound, dtype=jnp.float32)
        p["input_proj"].append(dict(
            w=w, b=jnp.zeros((HIDDEN,), jnp.float32),
            gamma=jnp.ones((HIDDEN,), jnp.float32),
            beta=jnp.zeros((HIDDEN,), jnp.float32)))

    # class_embed: Linear(HIDDEN, NUM_CLASSES), bias = -log((1-p)/p), p=0.01
    bias_value = -math.log((1 - 0.01) / 0.01)
    p["wc"] = 0.02 * jax.random.normal(next(ks), (HIDDEN, NUM_CLASSES),
                                       dtype=jnp.float32)
    p["bc"] = jnp.full((1, NUM_CLASSES), bias_value, jnp.float32)

    # bbox_embed: MLP(HIDDEN, HIDDEN, 4, 3); last layer weight/bias = 0,
    # bias[2:] = -2.0
    p["w1"] = 0.02 * jax.random.normal(next(ks), (HIDDEN, HIDDEN), jnp.float32)
    p["b1"] = jnp.zeros((1, HIDDEN), jnp.float32)
    p["w2"] = 0.02 * jax.random.normal(next(ks), (HIDDEN, HIDDEN), jnp.float32)
    p["b2"] = jnp.zeros((1, HIDDEN), jnp.float32)
    p["w3"] = jnp.zeros((HIDDEN, 4), jnp.float32)
    p["b3"] = jnp.array([[0.0, 0.0, -2.0, -2.0]], jnp.float32)

    # ObjectHead.linear2: Linear(HIDDEN, 1), weight = 0, bias = 0
    p["wo"] = jnp.zeros((HIDDEN, 1), jnp.float32)
    p["bo"] = jnp.zeros((1, 1), jnp.float32)

    # query_embed: nn.Embedding(NUM_QUERIES, 2*HIDDEN)
    p["query_embed"] = jax.random.normal(next(ks),
                                         (NUM_QUERIES, 2 * HIDDEN),
                                         dtype=jnp.float32)
    return p


# ============================================================================
# Glue: synthetic backbone / transformer (external modules in the reference)
# ============================================================================
def synthetic_backbone(samples):
    # TODO(synk): real backbone (ResNet + position encoding) is an external
    # module; replaced by deterministic average-pooling + fixed channel maps.
    B = samples.shape[0]
    # level 0: (B, 4, 8, 8)
    f0 = samples.reshape(B, 3, 8, 4, 8, 4).mean(axis=(3, 5))       # (B,3,8,8)
    m0 = (jnp.arange(3 * 4, dtype=jnp.float32).reshape(3, 4) / 12.0)
    feat0 = jnp.einsum("bchw,cd->bdhw", f0, m0)                    # (B,4,8,8)
    # level 1: (B, 8, 4, 4)
    f1 = feat0.reshape(B, 4, 4, 2, 4, 2).mean(axis=(3, 5))         # (B,4,4,4)
    m1 = (jnp.arange(4 * 8, dtype=jnp.float32).reshape(4, 8) / 32.0)
    feat1 = jnp.einsum("bchw,cd->bdhw", f1, m1)                    # (B,8,4,4)
    return [feat0, feat1]


def synthetic_transformer(srcs, query_embed):
    # TODO(synk): the deformable transformer is an external module; we emit
    # deterministic hs / references with the correct shapes & semantics.
    # srcs are channels-last (B, HW_l, HIDDEN) feature maps.
    B = srcs[0].shape[0]
    flat = jnp.concatenate(srcs, axis=1)                            # (B,sumHW,H)
    memory = flat.mean(axis=1)                                      # (B, H)
    q_pos, q_tgt = query_embed[:, :HIDDEN], query_embed[:, HIDDEN:]
    hs = jnp.stack([
        jnp.tanh(q_tgt[None, :, :] + 0.1 * (l + 1) * memory[:, None, :]
                 + 0.01 * q_pos[None, :, :])
        for l in range(NUM_DEC_LAYERS)], axis=0)                    # (L,B,Q,H)
    init_reference = jax.nn.sigmoid(
        jnp.broadcast_to(q_pos[None, :, :2], (B, NUM_QUERIES, 2)))  # (B,Q,2)
    inter_references = jax.nn.sigmoid(0.5 * hs[..., :2])            # (L,B,Q,2)
    return hs, init_reference, inter_references


# ============================================================================
# DeformableDETR.forward (two_stage=False, with_box_refine=False, aux_loss)
# ============================================================================
def deformable_detr_forward(samples, params):
    features = synthetic_backbone(samples)

    # input_proj over ALL backbone levels, one Pallas launch (kernel 1)
    srcs = input_proj_all_levels(features, params["input_proj"])

    hs, init_reference, inter_references = synthetic_transformer(
        srcs, params["query_embed"])

    # Fuse bbox-MLP layer 1, class_embed and ObjectHead into one (H, 49)
    # weight ([w1 | wc | wo]) once; bf16 operands, f32 biases.
    wcf = jnp.concatenate([params["w1"], params["wc"], params["wo"]],
                          axis=1).astype(jnp.bfloat16)
    bcf = jnp.concatenate([params["b1"], params["bc"], params["bo"]], axis=1)
    head_params = (wcf, bcf,
                   params["w2"].astype(jnp.bfloat16), params["b2"],
                   params["w3"].astype(jnp.bfloat16), params["b3"])

    # Per-level references: level 0 uses init_reference, level l>0 uses
    # inter_references[l-1] (as in the reference forward loop).
    references = jnp.concatenate(
        [init_reference[None], inter_references[:-1]], axis=0)     # (L,B,Q,2)

    # Single gridless Pallas launch over ALL decoder levels (kernel 2).
    outputs_class, outputs_coord, outputs_object = detr_heads_all_levels(
        hs, references, head_params)

    out = {"pred_logits": outputs_class[-1],
           "pred_boxes": outputs_coord[-1],
           "obj": outputs_object[-1],
           "aux_outputs": [
               {"pred_logits": a, "pred_boxes": b, "obj": c}
               for a, b, c in zip(outputs_class[:-1], outputs_coord[:-1],
                                  outputs_object[:-1])]}
    return out


if __name__ == "__main__":
    key = jax.random.PRNGKey(0)
    samples = jax.random.normal(key, (2, 3, 32, 32), dtype=jnp.float32)
    params = make_params(backbone_channels=[4, 8])

    fwd = jax.jit(deformable_detr_forward)
    out = fwd(samples, params)
    jax.block_until_ready(out)

    assert out["pred_logits"].shape == (2, NUM_QUERIES, NUM_CLASSES)
    assert out["pred_boxes"].shape == (2, NUM_QUERIES, 4)
    assert out["obj"].shape == (2, NUM_QUERIES, 1)
    assert len(out["aux_outputs"]) == NUM_DEC_LAYERS - 1
    assert bool(jnp.all(jnp.isfinite(out["pred_boxes"])))
    assert bool(jnp.all(jnp.isfinite(out["pred_logits"])))
    print("KERNEL_OK")
</pallas_src>

<mosaic_0001>
module attributes {stable_mosaic.version = 11 : i64} {
  func.func @_input_proj_kernel(%arg0: memref<128x4xbf16, #tpu.memory_space<vmem>>, %arg1: memref<4x32xbf16, #tpu.memory_space<vmem>>, %arg2: memref<1x32xf32, #tpu.memory_space<vmem>>, %arg3: memref<1x32xf32, #tpu.memory_space<vmem>>, %arg4: memref<1x32xf32, #tpu.memory_space<vmem>>, %arg5: memref<32x8xbf16, #tpu.memory_space<vmem>>, %arg6: memref<8x32xbf16, #tpu.memory_space<vmem>>, %arg7: memref<1x32xf32, #tpu.memory_space<vmem>>, %arg8: memref<1x32xf32, #tpu.memory_space<vmem>>, %arg9: memref<1x32xf32, #tpu.memory_space<vmem>>, %arg10: memref<2x64x32xf32, #tpu.memory_space<vmem>>, %arg11: memref<2x16x32xf32, #tpu.memory_space<vmem>>) attributes {dimension_semantics = [], scalar_prefetch = 0 : i64, scratch_operands = 0 : i64, tpu.core_type = #tpu.core_type<tc>} {
    %c0 = arith.constant 0 : index
    %c0_0 = arith.constant 0 : index
    %0 = vector.load %arg0[%c0, %c0_0] : memref<128x4xbf16, #tpu.memory_space<vmem>>, vector<128x4xbf16>
    %c0_1 = arith.constant 0 : index
    %c0_2 = arith.constant 0 : index
    %1 = vector.load %arg1[%c0_1, %c0_2] : memref<4x32xbf16, #tpu.memory_space<vmem>>, vector<4x32xbf16>
    %cst = arith.constant dense<0.000000e+00> : vector<128x32xf32>
    %2 = tpu.matmul %0, %1, %cst {dimension_numbers = #tpu.dot_dimension_numbers<[1], [0], [0], [1], [0, 0, 1, 1], [], []>} : vector<128x4xbf16>, vector<4x32xbf16>, vector<128x32xf32> -> vector<128x32xf32>
    %c0_3 = arith.constant 0 : index
    %c0_4 = arith.constant 0 : index
    %3 = vector.load %arg2[%c0_3, %c0_4] : memref<1x32xf32, #tpu.memory_space<vmem>>, vector<1x32xf32>
    %4 = vector.broadcast %3 : vector<1x32xf32> to vector<128x32xf32>
    %5 = arith.addf %2, %4 : vector<128x32xf32>
    %c0_5 = arith.constant 0 : index
    %c0_6 = arith.constant 0 : index
    %6 = vector.load %arg3[%c0_5, %c0_6] : memref<1x32xf32, #tpu.memory_space<vmem>>, vector<1x32xf32>
    %7 = vector.shape_cast %6 : vector<1x32xf32> to vector<1x32xf32>
    %8 = vector.broadcast %7 : vector<1x32xf32> to vector<64x32xf32>
    %c0_7 = arith.constant 0 : index
    %c0_8 = arith.constant 0 : index
    %9 = vector.load %arg4[%c0_7, %c0_8] : memref<1x32xf32, #tpu.memory_space<vmem>>, vector<1x32xf32>
    %10 = vector.shape_cast %9 : vector<1x32xf32> to vector<1x32xf32>
    %11 = vector.broadcast %10 : vector<1x32xf32> to vector<64x32xf32>
    %12 = vector.extract_strided_slice %5 {offsets = [0, 0], sizes = [64, 32], strides = [1, 1]} : vector<128x32xf32> to vector<64x32xf32>
    %cst_9 = arith.constant dense<0.000000e+00> : vector<32xf32>
    %13 = vector.multi_reduction <add>, %12, %cst_9 [0] : vector<64x32xf32> to vector<32xf32>
    %14 = vector.shape_cast %13 : vector<32xf32> to vector<1x32xf32>
    %cst_10 = arith.constant 6.400000e+01 : f32
    %15 = vector.broadcast %cst_10 : f32 to vector<1x32xf32>
    %16 = arith.divf %14, %15 : vector<1x32xf32>
    %17 = vector.broadcast %16 : vector<1x32xf32> to vector<64x32xf32>
    %18 = arith.subf %12, %17 : vector<64x32xf32>
    %19 = arith.mulf %18, %18 : vector<64x32xf32>
    %cst_11 = arith.constant dense<0.000000e+00> : vector<32xf32>
    %20 = vector.multi_reduction <add>, %19, %cst_11 [0] : vector<64x32xf32> to vector<32xf32>
    %21 = vector.shape_cast %20 : vector<32xf32> to vector<1x32xf32>
    %cst_12 = arith.constant 6.400000e+01 : f32
    %22 = vector.broadcast %cst_12 : f32 to vector<1x32xf32>
    %23 = arith.divf %21, %22 : vector<1x32xf32>
    %24 = vector.broadcast %16 : vector<1x32xf32> to vector<64x32xf32>
    %25 = arith.subf %12, %24 : vector<64x32xf32>
    %cst_13 = arith.constant 9.99999974E-6 : f32
    %26 = vector.broadcast %cst_13 : f32 to vector<1x32xf32>
    %27 = arith.addf %23, %26 : vector<1x32xf32>
    %28 = math.rsqrt %27 : vector<1x32xf32>
    %29 = vector.broadcast %28 : vector<1x32xf32> to vector<64x32xf32>
    %30 = arith.mulf %25, %29 : vector<64x32xf32>
    %31 = arith.mulf %30, %8 : vector<64x32xf32>
    %32 = arith.addf %31, %11 : vector<64x32xf32>
    %c0_14 = arith.constant 0 : index
    %c0_15 = arith.constant 0 : index
    %c0_16 = arith.constant 0 : index
    %33 = vector.load %arg10[%c0_14, %c0_15, %c0_16] : memref<2x64x32xf32, #tpu.memory_space<vmem>>, vector<1x64x32xf32>
    %34 = vector.shape_cast %33 : vector<1x64x32xf32> to vector<64x32xf32>
    %35 = vector.shape_cast %32 : vector<64x32xf32> to vector<1x64x32xf32>
    tpu.vector_store %arg10[%c0_14, %c0_15, %c0_16], %35 {strides = array<i32>} : memref<2x64x32xf32, #tpu.memory_space<vmem>>, vector<1x64x32xf32>,
    %36 = vector.extract_strided_slice %5 {offsets = [64, 0], sizes = [64, 32], strides = [1, 1]} : vector<128x32xf32> to vector<64x32xf32>
    %cst_17 = arith.constant dense<0.000000e+00> : vector<32xf32>
    %37 = vector.multi_reduction <add>, %36, %cst_17 [0] : vector<64x32xf32> to vector<32xf32>
    %38 = vector.shape_cast %37 : vector<32xf32> to vector<1x32xf32>
    %cst_18 = arith.constant 6.400000e+01 : f32
    %39 = vector.broadcast %cst_18 : f32 to vector<1x32xf32>
    %40 = arith.divf %38, %39 : vector<1x32xf32>
    %41 = vector.broadcast %40 : vector<1x32xf32> to vector<64x32xf32>
    %42 = arith.subf %36, %41 : vector<64x32xf32>
    %43 = arith.mulf %42, %42 : vector<64x32xf32>
    %cst_19 = arith.constant dense<0.000000e+00> : vector<32xf32>
    %44 = vector.multi_reduction <add>, %43, %cst_19 [0] : vector<64x32xf32> to vector<32xf32>
    %45 = vector.shape_cast %44 : vector<32xf32> to vector<1x32xf32>
    %cst_20 = arith.constant 6.400000e+01 : f32
    %46 = vector.broadcast %cst_20 : f32 to vector<1x32xf32>
    %47 = arith.divf %45, %46 : vector<1x32xf32>
    %48 = vector.broadcast %40 : vector<1x32xf32> to vector<64x32xf32>
    %49 = arith.subf %36, %48 : vector<64x32xf32>
    %cst_21 = arith.constant 9.99999974E-6 : f32
    %50 = vector.broadcast %cst_21 : f32 to vector<1x32xf32>
    %51 = arith.addf %47, %50 : vector<1x32xf32>
    %52 = math.rsqrt %51 : vector<1x32xf32>
    %53 = vector.broadcast %52 : vector<1x32xf32> to vector<64x32xf32>
    %54 = arith.mulf %49, %53 : vector<64x32xf32>
    %55 = arith.mulf %54, %8 : vector<64x32xf32>
    %56 = arith.addf %55, %11 : vector<64x32xf32>
    %c1 = arith.constant 1 : index
    %c0_22 = arith.constant 0 : index
    %c0_23 = arith.constant 0 : index
    %57 = vector.load %arg10[%c1, %c0_22, %c0_23] : memref<2x64x32xf32, #tpu.memory_space<vmem>>, vector<1x64x32xf32>
    %58 = vector.shape_cast %57 : vector<1x64x32xf32> to vector<64x32xf32>
    %59 = vector.shape_cast %56 : vector<64x32xf32> to vector<1x64x32xf32>
    tpu.vector_store %arg10[%c1, %c0_22, %c0_23], %59 {strides = array<i32>} : memref<2x64x32xf32, #tpu.memory_space<vmem>>, vector<1x64x32xf32>,
    %c0_24 = arith.constant 0 : index
    %c0_25 = arith.constant 0 : index
    %60 = vector.load %arg5[%c0_24, %c0_25] : memref<32x8xbf16, #tpu.memory_space<vmem>>, vector<32x8xbf16>
    %c0_26 = arith.constant 0 : index
    %c0_27 = arith.constant 0 : index
    %61 = vector.load %arg6[%c0_26, %c0_27] : memref<8x32xbf16, #tpu.memory_space<vmem>>, vector<8x32xbf16>
    %cst_28 = arith.constant dense<0.000000e+00> : vector<32x32xf32>
    %62 = tpu.matmul %60, %61, %cst_28 {dimension_numbers = #tpu.dot_dimension_numbers<[1], [0], [0], [1], [0, 0, 1, 1], [], []>} : vector<32x8xbf16>, vector<8x32xbf16>, vector<32x32xf32> -> vector<32x32xf32>
    %c0_29 = arith.constant 0 : index
    %c0_30 = arith.constant 0 : index
    %63 = vector.load %arg7[%c0_29, %c0_30] : memref<1x32xf32, #tpu.memory_space<vmem>>, vector<1x32xf32>
    %64 = vector.broadcast %63 : vector<1x32xf32> to vector<32x32xf32>
    %65 = arith.addf %62, %64 : vector<32x32xf32>
    %c0_31 = arith.constant 0 : index
    %c0_32 = arith.constant 0 : index
    %66 = vector.load %arg8[%c0_31, %c0_32] : memref<1x32xf32, #tpu.memory_space<vmem>>, vector<1x32xf32>
    %67 = vector.shape_cast %66 : vector<1x32xf32> to vector<1x32xf32>
    %68 = vector.broadcast %67 : vector<1x32xf32> to vector<16x32xf32>
    %c0_33 = arith.constant 0 : index
    %c0_34 = arith.constant 0 : index
    %69 = vector.load %arg9[%c0_33, %c0_34] : memref<1x32xf32, #tpu.memory_space<vmem>>, vector<1x32xf32>
    %70 = vector.shape_cast %69 : vector<1x32xf32> to vector<1x32xf32>
    %71 = vector.broadcast %70 : vector<1x32xf32> to vector<16x32xf32>
    %72 = vector.extract_strided_slice %65 {offsets = [0, 0], sizes = [16, 32], strides = [1, 1]} : vector<32x32xf32> to vector<16x32xf32>
    %cst_35 = arith.constant dense<0.000000e+00> : vector<32xf32>
    %73 = vector.multi_reduction <add>, %72, %cst_35 [0] : vector<16x32xf32> to vector<32xf32>
    %74 = vector.shape_cast %73 : vector<32xf32> to vector<1x32xf32>
    %cst_36 = arith.constant 1.600000e+01 : f32
    %75 = vector.broadcast %cst_36 : f32 to vector<1x32xf32>
    %76 = arith.divf %74, %75 : vector<1x32xf32>
    %77 = vector.broadcast %76 : vector<1x32xf32> to vector<16x32xf32>
    %78 = arith.subf %72, %77 : vector<16x32xf32>
    %79 = arith.mulf %78, %78 : vector<16x32xf32>
    %cst_37 = arith.constant dense<0.000000e+00> : vector<32xf32>
    %80 = vector.multi_reduction <add>, %79, %cst_37 [0] : vector<16x32xf32> to vector<32xf32>
    %81 = vector.shape_cast %80 : vector<32xf32> to vector<1x32xf32>
    %cst_38 = arith.constant 1.600000e+01 : f32
    %82 = vector.broadcast %cst_38 : f32 to vector<1x32xf32>
    %83 = arith.divf %81, %82 : vector<1x32xf32>
    %84 = vector.broadcast %76 : vector<1x32xf32> to vector<16x32xf32>
    %85 = arith.subf %72, %84 : vector<16x32xf32>
    %cst_39 = arith.constant 9.99999974E-6 : f32
    %86 = vector.broadcast %cst_39 : f32 to vector<1x32xf32>
    %87 = arith.addf %83, %86 : vector<1x32xf32>
    %88 = math.rsqrt %87 : vector<1x32xf32>
    %89 = vector.broadcast %88 : vector<1x32xf32> to vector<16x32xf32>
    %90 = arith.mulf %85, %89 : vector<16x32xf32>
    %91 = arith.mulf %90, %68 : vector<16x32xf32>
    %92 = arith.addf %91, %71 : vector<16x32xf32>
    %c0_40 = arith.constant 0 : index
    %c0_41 = arith.constant 0 : index
    %c0_42 = arith.constant 0 : index
    %93 = vector.load %arg11[%c0_40, %c0_41, %c0_42] : memref<2x16x32xf32, #tpu.memory_space<vmem>>, vector<1x16x32xf32>
    %94 = vector.shape_cast %93 : vector<1x16x32xf32> to vector<16x32xf32>
    %95 = vector.shape_cast %92 : vector<16x32xf32> to vector<1x16x32xf32>
    tpu.vector_store %arg11[%c0_40, %c0_41, %c0_42], %95 {strides = array<i32>} : memref<2x16x32xf32, #tpu.memory_space<vmem>>, vector<1x16x32xf32>,
    %96 = vector.extract_strided_slice %65 {offsets = [16, 0], sizes = [16, 32], strides = [1, 1]} : vector<32x32xf32> to vector<16x32xf32>
    %cst_43 = arith.constant dense<0.000000e+00> : vector<32xf32>
    %97 = vector.multi_reduction <add>, %96, %cst_43 [0] : vector<16x32xf32> to vector<32xf32>
    %98 = vector.shape_cast %97 : vector<32xf32> to vector<1x32xf32>
    %cst_44 = arith.constant 1.600000e+01 : f32
    %99 = vector.broadcast %cst_44 : f32 to vector<1x32xf32>
    %100 = arith.divf %98, %99 : vector<1x32xf32>
    %101 = vector.broadcast %100 : vector<1x32xf32> to vector<16x32xf32>
    %102 = arith.subf %96, %101 : vector<16x32xf32>
    %103 = arith.mulf %102, %102 : vector<16x32xf32>
    %cst_45 = arith.constant dense<0.000000e+00> : vector<32xf32>
    %104 = vector.multi_reduction <add>, %103, %cst_45 [0] : vector<16x32xf32> to vector<32xf32>
    %105 = vector.shape_cast %104 : vector<32xf32> to vector<1x32xf32>
    %cst_46 = arith.constant 1.600000e+01 : f32
    %106 = vector.broadcast %cst_46 : f32 to vector<1x32xf32>
    %107 = arith.divf %105, %106 : vector<1x32xf32>
    %108 = vector.broadcast %100 : vector<1x32xf32> to vector<16x32xf32>
    %109 = arith.subf %96, %108 : vector<16x32xf32>
    %cst_47 = arith.constant 9.99999974E-6 : f32
    %110 = vector.broadcast %cst_47 : f32 to vector<1x32xf32>
    %111 = arith.addf %107, %110 : vector<1x32xf32>
    %112 = math.rsqrt %111 : vector<1x32xf32>
    %113 = vector.broadcast %112 : vector<1x32xf32> to vector<16x32xf32>
    %114 = arith.mulf %109, %113 : vector<16x32xf32>
    %115 = arith.mulf %114, %68 : vector<16x32xf32>
    %116 = arith.addf %115, %71 : vector<16x32xf32>
    %c1_48 = arith.constant 1 : index
    %c0_49 = arith.constant 0 : index
    %c0_50 = arith.constant 0 : index
    %117 = vector.load %arg11[%c1_48, %c0_49, %c0_50] : memref<2x16x32xf32, #tpu.memory_space<vmem>>, vector<1x16x32xf32>
    %118 = vector.shape_cast %117 : vector<1x16x32xf32> to vector<16x32xf32>
    %119 = vector.shape_cast %116 : vector<16x32xf32> to vector<1x16x32xf32>
    tpu.vector_store %arg11[%c1_48, %c0_49, %c0_50], %119 {strides = array<i32>} : memref<2x16x32xf32, #tpu.memory_space<vmem>>, vector<1x16x32xf32>,
    return
  }
}

module attributes {stable_mosaic.version = 11 : i64} {
  func.func @_head_kernel(%arg0: memref<48x32xbf16, #tpu.memory_space<vmem>>, %arg1: memref<48x4xf32, #tpu.memory_space<vmem>>, %arg2: memref<32x49xbf16, #tpu.memory_space<vmem>>, %arg3: memref<1x49xf32, #tpu.memory_space<vmem>>, %arg4: memref<32x32xbf16, #tpu.memory_space<vmem>>, %arg5: memref<1x32xf32, #tpu.memory_space<vmem>>, %arg6: memref<32x4xbf16, #tpu.memory_space<vmem>>, %arg7: memref<1x4xf32, #tpu.memory_space<vmem>>, %arg8: memref<48x128xf32, #tpu.memory_space<vmem>>) attributes {dimension_semantics = [], scalar_prefetch = 0 : i64, scratch_operands = 0 : i64, tpu.core_type = #tpu.core_type<tc>} {
    %c0 = arith.constant 0 : index
    %c0_0 = arith.constant 0 : index
    %0 = vector.load %arg0[%c0, %c0_0] : memref<48x32xbf16, #tpu.memory_space<vmem>>, vector<48x32xbf16>
    %c0_1 = arith.constant 0 : index
    %c0_2 = arith.constant 0 : index
    %1 = vector.load %arg2[%c0_1, %c0_2] : memref<32x49xbf16, #tpu.memory_space<vmem>>, vector<32x49xbf16>
    %cst = arith.constant dense<0.000000e+00> : vector<48x49xf32>
    %2 = tpu.matmul %0, %1, %cst {dimension_numbers = #tpu.dot_dimension_numbers<[1], [0], [0], [1], [0, 0, 1, 1], [], []>} : vector<48x32xbf16>, vector<32x49xbf16>, vector<48x49xf32> -> vector<48x49xf32>
    %c0_3 = arith.constant 0 : index
    %c0_4 = arith.constant 0 : index
    %3 = vector.load %arg3[%c0_3, %c0_4] : memref<1x49xf32, #tpu.memory_space<vmem>>, vector<1x49xf32>
    %4 = vector.broadcast %3 : vector<1x49xf32> to vector<48x49xf32>
    %5 = arith.addf %2, %4 : vector<48x49xf32>
    %6 = vector.extract_strided_slice %5 {offsets = [0, 0], sizes = [48, 32], strides = [1, 1]} : vector<48x49xf32> to vector<48x32xf32>
    %cst_5 = arith.constant 0.000000e+00 : f32
    %7 = vector.broadcast %cst_5 : f32 to vector<48x32xf32>
    %8 = arith.maximumf %6, %7 : vector<48x32xf32>
    %9 = vector.extract_strided_slice %5 {offsets = [0, 32], sizes = [48, 16], strides = [1, 1]} : vector<48x49xf32> to vector<48x16xf32>
    %10 = vector.extract_strided_slice %5 {offsets = [0, 48], sizes = [48, 1], strides = [1, 1]} : vector<48x49xf32> to vector<48x1xf32>
    %11 = arith.negf %10 : vector<48x1xf32>
    %12 = math.exp %11 : vector<48x1xf32>
    %cst_6 = arith.constant 1.000000e+00 : f32
    %13 = vector.broadcast %cst_6 : f32 to vector<48x1xf32>
    %14 = arith.addf %13, %12 : vector<48x1xf32>
    %15 = arith.divf %13, %14 : vector<48x1xf32>
    %16 = arith.truncf %8 : vector<48x32xf32> to vector<48x32xbf16>
    %c0_7 = arith.constant 0 : index
    %c0_8 = arith.constant 0 : index
    %17 = vector.load %arg4[%c0_7, %c0_8] : memref<32x32xbf16, #tpu.memory_space<vmem>>, vector<32x32xbf16>
    %cst_9 = arith.constant dense<0.000000e+00> : vector<48x32xf32>
    %18 = tpu.matmul %16, %17, %cst_9 {dimension_numbers = #tpu.dot_dimension_numbers<[1], [0], [0], [1], [0, 0, 1, 1], [], []>} : vector<48x32xbf16>, vector<32x32xbf16>, vector<48x32xf32> -> vector<48x32xf32>
    %c0_10 = arith.constant 0 : index
    %c0_11 = arith.constant 0 : index
    %19 = vector.load %arg5[%c0_10, %c0_11] : memref<1x32xf32, #tpu.memory_space<vmem>>, vector<1x32xf32>
    %20 = vector.broadcast %19 : vector<1x32xf32> to vector<48x32xf32>
    %21 = arith.addf %18, %20 : vector<48x32xf32>
    %cst_12 = arith.constant 0.000000e+00 : f32
    %22 = vector.broadcast %cst_12 : f32 to vector<48x32xf32>
    %23 = arith.maximumf %21, %22 : vector<48x32xf32>
    %24 = arith.truncf %23 : vector<48x32xf32> to vector<48x32xbf16>
    %c0_13 = arith.constant 0 : index
    %c0_14 = arith.constant 0 : index
    %25 = vector.load %arg6[%c0_13, %c0_14] : memref<32x4xbf16, #tpu.memory_space<vmem>>, vector<32x4xbf16>
    %cst_15 = arith.constant dense<0.000000e+00> : vector<48x4xf32>
    %26 = tpu.matmul %24, %25, %cst_15 {dimension_numbers = #tpu.dot_dimension_numbers<[1], [0], [0], [1], [0, 0, 1, 1], [], []>} : vector<48x32xbf16>, vector<32x4xbf16>, vector<48x4xf32> -> vector<48x4xf32>
    %c0_16 = arith.constant 0 : index
    %c0_17 = arith.constant 0 : index
    %27 = vector.load %arg7[%c0_16, %c0_17] : memref<1x4xf32, #tpu.memory_space<vmem>>, vector<1x4xf32>
    %28 = vector.broadcast %27 : vector<1x4xf32> to vector<48x4xf32>
    %29 = arith.addf %26, %28 : vector<48x4xf32>
    %c0_18 = arith.constant 0 : index
    %c0_19 = arith.constant 0 : index
    %30 = vector.load %arg1[%c0_18, %c0_19] : memref<48x4xf32, #tpu.memory_space<vmem>>, vector<48x4xf32>
    %cst_20 = arith.constant 0.000000e+00 : f32
    %cst_21 = arith.constant 1.000000e+00 : f32
    %31 = vector.broadcast %cst_20 : f32 to vector<48x4xf32>
    %32 = arith.maximumf %31, %30 : vector<48x4xf32>
    %33 = vector.broadcast %cst_21 : f32 to vector<48x4xf32>
    %34 = arith.minimumf %33, %32 : vector<48x4xf32>
    %cst_22 = arith.constant 9.99999974E-6 : f32
    %35 = vector.broadcast %cst_22 : f32 to vector<48x4xf32>
    %36 = arith.maximumf %34, %35 : vector<48x4xf32>
    %cst_23 = arith.constant 1.000000e+00 : f32
    %37 = vector.broadcast %cst_23 : f32 to vector<48x4xf32>
    %38 = arith.subf %37, %34 : vector<48x4xf32>
    %cst_24 = arith.constant 9.99999974E-6 : f32
    %39 = vector.broadcast %cst_24 : f32 to vector<48x4xf32>
    %40 = arith.maximumf %38, %39 : vector<48x4xf32>
    %41 = arith.divf %36, %40 : vector<48x4xf32>
    %42 = math.log %41 : vector<48x4xf32>
    %43 = tpu.iota {dimensions = array<i32: 1>} : vector<48x4xi32>
    %c2_i32 = arith.constant 2 : i32
    %44 = vector.broadcast %c2_i32 : i32 to vector<48x4xi32>
    %45 = arith.cmpi slt, %43, %44 : vector<48x4xi32>
    %cst_25 = arith.constant 0.000000e+00 : f32
    %46 = vector.broadcast %cst_25 : f32 to vector<48x4xf32>
    %47 = arith.select %45, %42, %46 : vector<48x4xi1>, vector<48x4xf32>
    %48 = arith.addf %29, %47 : vector<48x4xf32>
    %49 = arith.negf %48 : vector<48x4xf32>
    %50 = math.exp %49 : vector<48x4xf32>
    %cst_26 = arith.constant 1.000000e+00 : f32
    %51 = vector.broadcast %cst_26 : f32 to vector<48x4xf32>
    %52 = arith.addf %51, %50 : vector<48x4xf32>
    %53 = arith.divf %51, %52 : vector<48x4xf32>
    %cst_27 = arith.constant 0.000000e+00 : f32
    %54 = vector.broadcast %cst_27 : f32 to vector<48x128xf32>
    %c0_28 = arith.constant 0 : index
    %c0_29 = arith.constant 0 : index
    %55 = vector.load %arg8[%c0_28, %c0_29] : memref<48x128xf32, #tpu.memory_space<vmem>>, vector<48x128xf32>
    tpu.vector_store %arg8[%c0_28, %c0_29], %54 {strides = array<i32>} : memref<48x128xf32, #tpu.memory_space<vmem>>, vector<48x128xf32>,
    %c0_30 = arith.constant 0 : index
    %c0_31 = arith.constant 0 : index
    %56 = vector.load %arg8[%c0_30, %c0_31] : memref<48x128xf32, #tpu.memory_space<vmem>>, vector<48x16xf32>
    tpu.vector_store %arg8[%c0_30, %c0_31], %9 {strides = array<i32>} : memref<48x128xf32, #tpu.memory_space<vmem>>, vector<48x16xf32>,
    %c0_32 = arith.constant 0 : index
    %c16 = arith.constant 16 : index
    %57 = vector.load %arg8[%c0_32, %c16] : memref<48x128xf32, #tpu.memory_space<vmem>>, vector<48x4xf32>
    tpu.vector_store %arg8[%c0_32, %c16], %53 {strides = array<i32>} : memref<48x128xf32, #tpu.memory_space<vmem>>, vector<48x4xf32>,
    %c0_33 = arith.constant 0 : index
    %c20 = arith.constant 20 : index
    %58 = vector.load %arg8[%c0_33, %c20] : memref<48x128xf32, #tpu.memory_space<vmem>>, vector<48x1xf32>
    tpu.vector_store %arg8[%c0_33, %c20], %15 {strides = array<i32>} : memref<48x128xf32, #tpu.memory_space<vmem>>, vector<48x1xf32>,
    return
  }
}

</mosaic_0001>

<bundles_post_ra>
// kernel: deformable_detr_forward.2
= control target key start
LH: loop header
LB: loop body
LE: loop exit
PB: predicated region body
PF: predicated region fallthrough
CT: control target
= control target key end

     0   :  { %vm124_vm0 = vcmask 1041408   ;;  %vm426_vm1 = vcmask 1043456   ;;  %vm99_vm2 = vcmask 31744   ;;  %vm419_vm3 = vcmask 64512   ;;  %s1157_s1 = inlined_call_operand.vmem [shape: bf16[4,32], index: 1, kind: input, shape index: {}]   ;;  %s1158_s6 = inlined_call_operand.vmem [shape: bf16[8,32], index: 6, kind: input, shape index: {}]   ;;  %s1159_s0 = inlined_call_operand.vmem [shape: bf16[128,4], index: 0, kind: input, shape index: {}]   ;;  %s1160_s5 = inlined_call_operand.vmem [shape: bf16[32,8], index: 5, kind: input, shape index: {}]   ;;  %s1161_s2 = inlined_call_operand.vmem [shape: f32[1,32], index: 2, kind: input, shape index: {}]   ;;  %s1162_s7 = inlined_call_operand.vmem [shape: f32[1,32], index: 7, kind: input, shape index: {}]   ;;  %s1163_s8 = inlined_call_operand.vmem [shape: f32[1,32], index: 8, kind: input, shape index: {}]   ;;  %s1164_s9 = inlined_call_operand.vmem [shape: f32[1,32], index: 9, kind: input, shape index: {}]   ;;  %s1165_s3 = inlined_call_operand.vmem [shape: f32[1,32], index: 3, kind: input, shape index: {}]   ;;  %s1166_s4 = inlined_call_operand.vmem [shape: f32[1,32], index: 4, kind: input, shape index: {}]   ;;  %s1167_s11 = inlined_call_operand.vmem [shape: f32[2,16,32], index: 11, kind: output, shape index: {1}]   ;;  %s1168_s10 = inlined_call_operand.vmem [shape: f32[2,64,32], index: 10, kind: output, shape index: {0}]  }
   0x1   :  { %v54_v0 = vld [vmem:[%s1157_s1] sm:$0x3]  ;;  %v622_v5 = vld [vmem:[%s1159_s0 + $0x18] sm:$0xff]  ;;  %v625_v7 = vld [vmem:[%s1159_s0 + $0x30] sm:$0xff]  ;;  %v651_v14 = vmov 16.0   ;;  %vm185_vm4 = vcmask 261120  }
   0x2   :  { %v404_v1 = vld [vmem:[%s1158_s6] sm:$0xf]  ;;  %v126_v2 = vsel %vm124_vm0, %v54_v0, 0  ;;  %v620_v8 = vld [vmem:[%s1159_s0 + $0x8] sm:$0xff]  ;;  %v626_v11 = vld [vmem:[%s1159_s0 + $0x38] sm:$0xff]  ;;  %639 = vrcp.f32 %v651_v14 }
   0x3   :  { %v428_v3 = vsel %vm426_vm1, %v404_v1, 0  ;;  %v619_v4 = vld [vmem:[%s1159_s0] sm:$0xff]  ;;  %135 = vmatpush.bf16.msra.mxu0 %v126_v2  ;;  %629 = vmatpush.bf16.msra.mxu2 %v126_v2  ;;  %v628_v10 = vld [vmem:[%s1160_s5 + $0x8] sm:$0xff]  ;;  %v621_v12 = vld [vmem:[%s1159_s0 + $0x10] sm:$0xff] }
   0x4   :  { %v627_v6 = vld [vmem:[%s1160_s5] sm:$0xff]  ;;  %437 = vmatpush.bf16.msra.mxu1 %v428_v3  ;;  %630 = vmatpush.bf16.msra.mxu3 %v126_v2  ;;  %v624_v13 = vld [vmem:[%s1159_s0 + $0x28] sm:$0xff] }
   0x5   :  { %v623_v9 = vld [vmem:[%s1159_s0 + $0x20] sm:$0xff] }
   0x6   :  { %591 = vmatmul.msk.bf16.vlgmr.msra.gmra.mxu0 %vm99_vm2, %v619_v4  ;;  %594 = vmatmul.msk.bf16.vlgmr.msra.gmra.mxu2 %vm99_vm2, %v622_v5  ;;  %v634_v17 = vld [vmem:[%s1162_s7] ss:$0 sm:$0xff] }
   0x7   :  { %615 = vmatmul.msk.bf16.vlgmr.msra.gmra.mxu1 %vm419_vm3, %v627_v6  ;;  %597 = vmatmul.msk.bf16.vlgmr.msra.gmra.mxu3 %vm99_vm2, %v625_v7  ;;  %v775_v46 = vld [vmem:[%s1161_s2] ss:$0 sm:$0xff]  ;;  %v652_v6 = vmov 64.0  }
   0x8   :  { %v640_v18 = vpop.eup %639  ;;  %641 = vrcp.f32 %v652_v6 }
   0x9   :  { %v467_v22 = vmul.f32 16.0, %v640_v18  ;;  %vm471_vm5 = vweird.f32 %v640_v18 }
   0xb   :  { %v468_v27 = vsub.f32 1.0, %v467_v22 }
   0xd   :  { %v469_v31 = vmul.f32 %v640_v18, %v468_v27 }
   0xf   :  { %v470_v36 = vadd.f32 %v640_v18, %v469_v31 }
  0x11   :  { %v770_v42 = vsel %vm471_vm5, %v640_v18, %v470_v36 }
  0x16   :  { %592 = vmatmul.msk.bf16.gmra.mxu0 %vm99_vm2, %v620_v8  ;;  %595 = vmatmul.msk.bf16.gmra.mxu2 %vm99_vm2, %v623_v9 }
  0x17   :  { %616 = vmatmul.msk.bf16.gmra.mxu1 %vm419_vm3, %v628_v10  ;;  %598 = vmatmul.msk.bf16.gmra.mxu3 %vm99_vm2, %v626_v11 }
  0x26   :  { %593 = vmatmul.msk.bf16.gmra.mxu0 %vm99_vm2, %v621_v12  ;;  %596 = vmatmul.msk.bf16.gmra.mxu2 %vm99_vm2, %v624_v13 }
  0x83   :  { %v137_v15 = vpop.f32.mrf.mxu0 }
  0x84   :  { %v439_v16 = vpop.f32.mrf.mxu1  ;;  %v781_v50 = vadd.f32 %v775_v46, %v137_v15 }
  0x85   :  { %v440_v19 = vadd.f32 %v634_v17, %v439_v16 }
  0x86   :  { %v186_v61 = vsel %vm185_vm4, %v781_v50, 0.0 }
  0x87   :  { %v457_v24 = vsel %vm185_vm4, %v440_v19, 0.0 }
  0x89   :  { %v760_v20 = vpop.f32.mrf.mxu2 }
  0x8a   :  { %v768_v41 = vpop.f32.mrf.mxu3  ;;  %v823_v22 = vadd.f32 %v775_v46, %v760_v20 }
  0x8b   :  { %v139_v21 = vpop.f32.mrf.mxu0 }
  0x8c   :  { %v441_v23 = vpop.f32.mrf.mxu1  ;;  %v784_v51 = vadd.f32 %v775_v46, %v139_v21  ;;  %v819_v21 = vpop.eup %641 }
  0x8d   :  { %v442_v25 = vadd.f32 %v634_v17, %v441_v23  ;;  %vm212_vm6 = vweird.f32 %v819_v21 }
  0x8e   :  { %v187_v62 = vsel %vm185_vm4, %v784_v51, 0.0 }
  0x8f   :  { %v458_v26 = vsel %vm185_vm4, %v442_v25, 0.0  ;;  %v188_v10 = vadd.f32 %v187_v62, %v186_v61  ;;  %v867_v62 = vadd.f32 %v775_v46, %v768_v41 }
  0x90   :  { %v459_v28 = vadd.f32 %v458_v26, %v457_v24 }
  0x91   :  { %v764_v29 = vpop.f32.mrf.mxu2 }
  0x92   :  { %v460_v30 = vrot.slane %v459_v28, 4  ;;  %v169_v4 = vpop.f32.mrf.mxu3 }
  0x93   :  { %v142_v32 = vpop.f32.mrf.mxu0 }
  0x94   :  { %v461_v33 = vadd.f32 %v460_v30, %v459_v28  ;;  %v444_v34 = vpop.f32.mrf.mxu1  ;;  %v796_v59 = vadd.f32 %v775_v46, %v142_v32  ;;  %v836_v32 = vadd.f32 %v775_v46, %v764_v29 }
  0x95   :  { %v766_v38 = vadd.f32 %v634_v17, %v444_v34 }
  0x96   :  { %v462_v35 = vrot.slane %v461_v33, 2  ;;  %v189_v7 = vsel %vm185_vm4, %v796_v59, 0.0 }
  0x97   :  { %v507_v47 = vsel %vm185_vm4, %v766_v38, 0.0  ;;  %v190_v15 = vadd.f32 %v189_v7, %v188_v10 }
  0x98   :  { %v463_v37 = vadd.f32 %v462_v35, %v461_v33 }
  0x99   :  { %v157_v39 = vpop.f32.mrf.mxu2 }
  0x9a   :  { %v464_v40 = vrot.slane %v463_v37, 1  ;;  %v826_v26 = vadd.f32 %v775_v46, %v157_v39  ;;  %v172_v35 = vpop.f32.mrf.mxu3  ;;  %v197_v39 = vsel %vm185_vm4, %v823_v22, 0.0 }
  0x9b   :  { %v144_v43 = vpop.f32.mrf.mxu0 }
  0x9c   :  { %v465_v44 = vadd.f32 %v464_v40, %v463_v37  ;;  %v446_v45 = vpop.f32.mrf.mxu1  ;;  %v805_v2 = vadd.f32 %v775_v46, %v144_v43  ;;  %v208_v37 = vmul.f32 64.0, %v819_v21  ;;  %v296_v29 = vsel %vm185_vm4, %v826_v26, 0.0 }
  0x9d   :  { %v447_v48 = vadd.f32 %v634_v17, %v446_v45 }
  0x9e   :  { %v473_v49 = vmul.f32 %v770_v42, %v465_v44  ;;  %v191_v12 = vsel %vm185_vm4, %v805_v2, 0.0 }
  0x9f   :  { %v508_v52 = vsel %vm185_vm4, %v447_v48, 0.0  ;;  %v192_v24 = vadd.f32 %v191_v12, %v190_v15  ;;  %v877_v12 = vadd.f32 %v775_v46, %v172_v35 }
  0xa0   :  { %v787_v53 = vsub.f32 %v440_v19, %v473_v49  ;;  %v789_v54 = vsub.f32 %v442_v25, %v473_v49  ;;  %v509_v55 = vadd.f32 %v508_v52, %v507_v47  ;;  %v199_v52 = vsel %vm185_vm4, %v836_v32, 0.0 }
  0xa1   :  { %v159_v56 = vpop.f32.mrf.mxu2 }
  0xa2   :  { %v476_v57 = vmul.f32 %v787_v53, %v787_v53  ;;  %v477_v58 = vmul.f32 %v789_v54, %v789_v54  ;;  %v510_v60 = vrot.slane %v509_v55, 4  ;;  %v815_v18 = vadd.f32 %v775_v46, %v159_v56 }
  0xa3   :  { %v147_v63 = vpop.f32.mrf.mxu0 }
  0xa4   :  { %v478_v0 = vsel %vm185_vm4, %v476_v57, 0.0  ;;  %v479_v1 = vsel %vm185_vm4, %v477_v58, 0.0  ;;  %v511_v3 = vadd.f32 %v510_v60, %v509_v55  ;;  %v810_v9 = vadd.f32 %v775_v46, %v147_v63 }
  0xa5   :  { %v480_v5 = vadd.f32 %v479_v1, %v478_v0  ;;  %v297_v34 = vsel %vm185_vm4, %v815_v18, 0.0 }
  0xa6   :  { %v512_v8 = vrot.slane %v511_v3, 2  ;;  %v193_v19 = vsel %vm185_vm4, %v810_v9, 0.0  ;;  %v298_v55 = vadd.f32 %v297_v34, %v296_v29 }
  0xa7   :  { %v481_v11 = vrot.slane %v480_v5, 4  ;;  %v194_v20 = vadd.f32 %v193_v19, %v192_v24  ;;  %v307_v24 = vsel %vm185_vm4, %v877_v12, 0.0 }
  0xa8   :  { %v513_v13 = vadd.f32 %v512_v8, %v511_v3 }
  0xa9   :  { %v482_v14 = vadd.f32 %v481_v11, %v480_v5  ;;  %v162_v16 = vpop.f32.mrf.mxu2  ;;  %v872_v5 = vadd.f32 %v775_v46, %v169_v4 }
  0xaa   :  { %v514_v17 = vrot.slane %v513_v13, 1  ;;  %v829_v28 = vadd.f32 %v775_v46, %v162_v16  ;;  %v174_v16 = vpop.f32.mrf.mxu3 }
  0xab   :  { %v483_v23 = vrot.slane %v482_v14, 2  ;;  %v149_v25 = vpop.f32.mrf.mxu0  ;;  %v305_v19 = vsel %vm185_vm4, %v872_v5, 0.0 }
  0xac   :  { %v515_v27 = vadd.f32 %v514_v17, %v513_v13  ;;  %v832_v30 = vadd.f32 %v775_v46, %v149_v25  ;;  %v299_v47 = vsel %vm185_vm4, %v829_v28, 0.0  ;;  %v303_v13 = vsel %vm185_vm4, %v867_v62, 0.0 }
  0xad   :  { %v484_v31 = vadd.f32 %v483_v23, %v482_v14  ;;  %v300_v63 = vadd.f32 %v299_v47, %v298_v55 }
  0xae   :  { %v516_v33 = vmul.f32 %v515_v27, %v770_v42  ;;  %v195_v36 = vsel %vm185_vm4, %v832_v30, 0.0 }
  0xaf   :  { %v485_v40 = vrot.slane %v484_v31, 1  ;;  %v196_v43 = vadd.f32 %v195_v36, %v194_v20 }
  0xb0   :  { %v849_v44 = vsub.f32 %v766_v38, %v516_v33  ;;  %v851_v45 = vsub.f32 %v447_v48, %v516_v33  ;;  %v209_v38 = vsub.f32 1.0, %v208_v37  ;;  %v889_v33 = vadd.f32 %v775_v46, %v174_v16 }
  0xb1   :  { %v486_v49 = vadd.f32 %v485_v40, %v484_v31  ;;  %v198_v56 = vadd.f32 %v197_v39, %v196_v43  ;;  %v164_v57 = vpop.f32.mrf.mxu2 }
  0xb2   :  { %v519_v58 = vmul.f32 %v849_v44, %v849_v44  ;;  %v520_v60 = vmul.f32 %v851_v45, %v851_v45  ;;  %v862_v48 = vadd.f32 %v775_v46, %v164_v57  ;;  %v210_v41 = vmul.f32 %v819_v21, %v209_v38 }
  0xb3   :  { %v487_v61 = vmul.f32 %v486_v49, %v770_v42  ;;  %v200_v0 = vadd.f32 %v199_v52, %v198_v56  ;;  %v309_v47 = vsel %vm185_vm4, %v889_v33, 0.0 }
  0xb4   :  { %v521_v1 = vsel %vm185_vm4, %v519_v58, 0.0  ;;  %v522_v3 = vsel %vm185_vm4, %v520_v60, 0.0  ;;  %v301_v6 = vsel %vm185_vm4, %v862_v48, 0.0  ;;  %v211_v25 = vadd.f32 %v819_v21, %v210_v41 }
  0xb5   :  { %v488_v7 = vadd.f32 1e-05, %v487_v61  ;;  %v523_v8 = vadd.f32 %v522_v3, %v521_v1  ;;  %v201_v10 = vrot.slane %v200_v0, 4  ;;  %v302_v11 = vadd.f32 %v301_v6, %v300_v63 }
  0xb6   :  { %v892_v40 = vsel %vm212_vm6, %v819_v21, %v211_v25 }
  0xb7   :  { %643 = vrsqrt.f32 %v488_v7  ;;  %v524_v14 = vrot.slane %v523_v8, 4  ;;  %v202_v15 = vadd.f32 %v201_v10, %v200_v0  ;;  %v304_v4 = vadd.f32 %v303_v13, %v302_v11  ;;  %v931_v10 = vld [vmem:[%s1164_s9] ss:$0 sm:$0xff] }
  0xb8   :  { %vm495_vm7 = vweird.f32 %v488_v7 }
  0xb9   :  { %v525_v17 = vadd.f32 %v524_v14, %v523_v8  ;;  %v203_v23 = vrot.slane %v202_v15, 2  ;;  %v306_v27 = vadd.f32 %v305_v19, %v304_v4 }
  0xbb   :  { %v526_v31 = vrot.slane %v525_v17, 2  ;;  %v204_v20 = vadd.f32 %v203_v23, %v202_v15  ;;  %v308_v34 = vadd.f32 %v307_v24, %v306_v27 }
  0xbd   :  { %v644_v35 = vpop.eup %643  ;;  %v527_v36 = vadd.f32 %v526_v31, %v525_v17  ;;  %v205_v37 = vrot.slane %v204_v20, 1  ;;  %v310_v52 = vadd.f32 %v309_v47, %v308_v34 }
  0xbe   :  { %v490_v39 = vmul.f32 %v644_v35, %v488_v7  ;;  %vm496_vm8 = vweird.f32 %v644_v35 }
  0xbf   :  { %v528_v43 = vrot.slane %v527_v36, 1  ;;  %v206_v29 = vadd.f32 %v205_v37, %v204_v20  ;;  %v311_v61 = vrot.slane %v310_v52, 4  ;;  %vm497_vm9 = vmor %vm495_vm7, %vm496_vm8 }
  0xc0   :  { %v491_v49 = vmul.f32 %v644_v35, %v490_v39 }
  0xc1   :  { %v529_v55 = vadd.f32 %v528_v43, %v527_v36  ;;  %v214_v56 = vmul.f32 %v892_v40, %v206_v29  ;;  %v312_v8 = vadd.f32 %v311_v61, %v310_v52 }
  0xc2   :  { %v492_v46 = vmul.f32 0.5, %v491_v49 }
  0xc3   :  { %v530_v57 = vmul.f32 %v529_v55, %v770_v42  ;;  %v899_v58 = vsub.f32 %v781_v50, %v214_v56  ;;  %v902_v60 = vsub.f32 %v784_v51, %v214_v56  ;;  %v905_v21 = vsub.f32 %v796_v59, %v214_v56  ;;  %v917_v51 = vld [vmem:[%s1163_s8] ss:$0 sm:$0xff] }
  0xc4   :  { %v493_v38 = vsub.f32 1.5, %v492_v46  ;;  %v908_v0 = vsub.f32 %v805_v2, %v214_v56  ;;  %v920_v59 = vsub.f32 %v810_v9, %v214_v56  ;;  %v925_v6 = vsub.f32 %v832_v30, %v214_v56 }
  0xc5   :  { %v531_v63 = vadd.f32 1e-05, %v530_v57  ;;  %v223_v42 = vmul.f32 %v899_v58, %v899_v58  ;;  %v224_v50 = vmul.f32 %v902_v60, %v902_v60  ;;  %v225_v2 = vmul.f32 %v905_v21, %v905_v21 }
  0xc6   :  { %v494_v1 = vmul.f32 %v644_v35, %v493_v38  ;;  %v226_v41 = vmul.f32 %v908_v0, %v908_v0  ;;  %v939_v30 = vsub.f32 %v823_v22, %v214_v56  ;;  %v227_v16 = vmul.f32 %v920_v59, %v920_v59 }
  0xc7   :  { %645 = vrsqrt.f32 %v531_v63  ;;  %v231_v7 = vsel %vm185_vm4, %v223_v42, 0.0  ;;  %v232_v13 = vsel %vm185_vm4, %v224_v50, 0.0  ;;  %v313_v19 = vrot.slane %v312_v8, 2 }
  0xc8   :  { %v498_v3 = vsel %vm497_vm9, %v644_v35, %v494_v1  ;;  %v233_v14 = vadd.f32 %v232_v13, %v231_v7  ;;  %v228_v25 = vmul.f32 %v925_v6, %v925_v6  ;;  %v236_v27 = vsel %vm185_vm4, %v226_v41, 0.0 }
  0xc9   :  { %v499_v11 = vmul.f32 %v498_v3, %v787_v53  ;;  %v500_v9 = vmul.f32 %v498_v3, %v789_v54  ;;  %v234_v53 = vsel %vm185_vm4, %v225_v2, 0.0  ;;  %v947_v54 = vsub.f32 %v836_v32, %v214_v56 }
  0xca   :  { %v235_v17 = vadd.f32 %v234_v53, %v233_v14  ;;  %v314_v34 = vadd.f32 %v313_v19, %v312_v8  ;;  %v229_v32 = vmul.f32 %v939_v30, %v939_v30  ;;  %v238_v35 = vsel %vm185_vm4, %v227_v16, 0.0 }
  0xcb   :  { %v501_v15 = vmul.f32 %v917_v51, %v499_v11  ;;  %v502_v4 = vmul.f32 %v917_v51, %v500_v9  ;;  %v230_v43 = vmul.f32 %v947_v54, %v947_v54  ;;  %v240_v29 = vsel %vm185_vm4, %v228_v25, 0.0 }
  0xcc   :  { %v237_v20 = vadd.f32 %v236_v27, %v235_v17  ;;  %v315_v39 = vrot.slane %v314_v34, 1  ;;  %vm538_vm10 = vweird.f32 %v531_v63  ;;  %v242_v55 = vsel %vm185_vm4, %v229_v32, 0.0 }
  0xcd   :  { %v646_v23 = vpop.eup %645  ;;  %v503_v24 = vadd.f32 %v931_v10, %v501_v15  ;;  %v504_v22 = vadd.f32 %v931_v10, %v502_v4  ;;  %v244_v38 = vsel %vm185_vm4, %v230_v43, 0.0 }
  0xce   :  { %v533_v31 = vmul.f32 %v646_v23, %v531_v63  ;;  %v239_v37 = vadd.f32 %v238_v35, %v237_v20  ;;  %v316_v52 = vadd.f32 %v315_v39, %v314_v34  ;;  %vm539_vm11 = vweird.f32 %v646_v23 }
  0xcf   :  { %505 = vst.msk [vmem:[%s1167_s11] sm:$0xff] %vm185_vm4, %v503_v24  ;;  %vm540_vm12 = vmor %vm538_vm10, %vm539_vm11 }
  0xd0   :  { %506 = vst.msk [vmem:[%s1167_s11 + $0x8] sm:$0xff] %vm185_vm4, %v504_v22  ;;  %v534_v36 = vmul.f32 %v646_v23, %v533_v31  ;;  %v241_v49 = vadd.f32 %v240_v29, %v239_v37  ;;  %v317_v57 = vmul.f32 %v316_v52, %v892_v40 }
  0xd2   :  { %v535_v47 = vmul.f32 0.5, %v534_v36  ;;  %v243_v46 = vadd.f32 %v242_v55, %v241_v49  ;;  %v972_v1 = vsub.f32 %v826_v26, %v317_v57  ;;  %v975_v50 = vsub.f32 %v815_v18, %v317_v57 }
  0xd3   :  { %v978_v63 = vsub.f32 %v829_v28, %v317_v57  ;;  %v981_v7 = vsub.f32 %v862_v48, %v317_v57  ;;  %v990_v41 = vsub.f32 %v867_v62, %v317_v57  ;;  %v1006_v19 = vsub.f32 %v877_v12, %v317_v57 }
  0xd4   :  { %v536_v56 = vsub.f32 1.5, %v535_v47  ;;  %v245_v42 = vadd.f32 %v244_v38, %v243_v46  ;;  %v326_v26 = vmul.f32 %v972_v1, %v972_v1  ;;  %v327_v18 = vmul.f32 %v975_v50, %v975_v50 }
  0xd5   :  { %v328_v28 = vmul.f32 %v978_v63, %v978_v63  ;;  %v329_v14 = vmul.f32 %v981_v7, %v981_v7  ;;  %v1020_v12 = vsub.f32 %v889_v33, %v317_v57  ;;  %v332_v31 = vmul.f32 %v1006_v19, %v1006_v19 }
  0xd6   :  { %v537_v61 = vmul.f32 %v646_v23, %v536_v56  ;;  %v246_v3 = vrot.slane %v245_v42, 4  ;;  %v334_v15 = vsel %vm185_vm4, %v326_v26, 0.0  ;;  %v335_v4 = vsel %vm185_vm4, %v327_v18, 0.0  ;;  %v1038_v26 = vld [vmem:[%s1165_s3] ss:$0 sm:$0xff] }
  0xd7   :  { %v336_v53 = vadd.f32 %v335_v4, %v334_v15  ;;  %v339_v22 = vsel %vm185_vm4, %v329_v14, 0.0  ;;  %v333_v35 = vmul.f32 %v1020_v12, %v1020_v12  ;;  %v345_v39 = vsel %vm185_vm4, %v332_v31, 0.0 }
  0xd8   :  { %v541_v2 = vsel %vm540_vm12, %v646_v23, %v537_v61  ;;  %v247_v9 = vadd.f32 %v246_v3, %v245_v42 }
  0xd9   :  { %v542_v8 = vmul.f32 %v541_v2, %v849_v44  ;;  %v543_v11 = vmul.f32 %v541_v2, %v851_v45  ;;  %v997_v44 = vsub.f32 %v872_v5, %v317_v57  ;;  %v330_v5 = vmul.f32 %v990_v41, %v990_v41 }
  0xda   :  { %v248_v45 = vrot.slane %v247_v9, 2  ;;  %v347_v29 = vsel %vm185_vm4, %v333_v35, 0.0 }
  0xdb   :  { %v544_v48 = vmul.f32 %v917_v51, %v542_v8  ;;  %v545_v13 = vmul.f32 %v917_v51, %v543_v11  ;;  %v337_v51 = vsel %vm185_vm4, %v328_v28, 0.0  ;;  %v331_v24 = vmul.f32 %v997_v44, %v997_v44  ;;  %v1043_v28 = vld [vmem:[%s1166_s4] ss:$0 sm:$0xff] }
  0xdc   :  { %v249_v17 = vadd.f32 %v248_v45, %v247_v9  ;;  %v338_v23 = vadd.f32 %v337_v51, %v336_v53  ;;  %v341_v20 = vsel %vm185_vm4, %v330_v5, 0.0 }
  0xdd   :  { %v546_v62 = vadd.f32 %v931_v10, %v544_v48  ;;  %v547_v16 = vadd.f32 %v931_v10, %v545_v13  ;;  %v343_v33 = vsel %vm185_vm4, %v331_v24, 0.0 }
  0xde   :  { %v250_v10 = vrot.slane %v249_v17, 1  ;;  %v340_v25 = vadd.f32 %v339_v22, %v338_v23 }
  0xdf   :  { %617 = vst.msk [vmem:[%s1167_s11 + $0x10] sm:$0xff] %vm185_vm4, %v546_v62 }
  0xe0   :  { %618 = vst.msk [vmem:[%s1167_s11 + $0x18] sm:$0xff] %vm185_vm4, %v547_v16  ;;  %v251_v27 = vadd.f32 %v250_v10, %v249_v17  ;;  %v342_v34 = vadd.f32 %v341_v20, %v340_v25 }
  0xe2   :  { %v252_v32 = vmul.f32 %v251_v27, %v892_v40  ;;  %v344_v36 = vadd.f32 %v343_v33, %v342_v34 }
  0xe4   :  { %v253_v37 = vadd.f32 1e-05, %v252_v32  ;;  %v346_v43 = vadd.f32 %v345_v39, %v344_v36 }
  0xe6   :  { %647 = vrsqrt.f32 %v253_v37  ;;  %v348_v47 = vadd.f32 %v347_v29, %v346_v43  ;;  %vm260_vm14 = vweird.f32 %v253_v37 }
  0xe8   :  { %v349_v49 = vrot.slane %v348_v47, 4 }
  0xea   :  { %v350_v52 = vadd.f32 %v349_v49, %v348_v47 }
  0xec   :  { %v648_v55 = vpop.eup %647  ;;  %v351_v46 = vrot.slane %v350_v52, 2 }
  0xed   :  { %v255_v56 = vmul.f32 %v648_v55, %v253_v37  ;;  %vm261_vm13 = vweird.f32 %v648_v55 }
  0xee   :  { %v352_v38 = vadd.f32 %v351_v46, %v350_v52  ;;  %vm262_vm15 = vmor %vm260_vm14, %vm261_vm13 }
  0xef   :  { %v256_v57 = vmul.f32 %v648_v55, %v255_v56 }
  0xf0   :  { %v353_v42 = vrot.slane %v352_v38, 1 }
  0xf1   :  { %v257_v61 = vmul.f32 0.5, %v256_v57 }
  0xf2   :  { %v354_v3 = vadd.f32 %v353_v42, %v352_v38 }
  0xf3   :  { %v258_v2 = vsub.f32 1.5, %v257_v61 }
  0xf4   :  { %v355_v11 = vmul.f32 %v354_v3, %v892_v40 }
  0xf5   :  { %v259_v8 = vmul.f32 %v648_v55, %v258_v2 }
  0xf6   :  { %v356_v9 = vadd.f32 1e-05, %v355_v11 }
  0xf7   :  { %v263_v18 = vsel %vm262_vm15, %v648_v55, %v259_v8 }
  0xf8   :  { %v264_v48 = vmul.f32 %v263_v18, %v899_v58  ;;  %v265_v13 = vmul.f32 %v263_v18, %v902_v60  ;;  %v266_v45 = vmul.f32 %v263_v18, %v905_v21  ;;  %v267_v40 = vmul.f32 %v263_v18, %v908_v0 }
  0xf9   :  { %v268_v14 = vmul.f32 %v263_v18, %v920_v59  ;;  %v269_v15 = vmul.f32 %v263_v18, %v925_v6  ;;  %v270_v4 = vmul.f32 %v263_v18, %v939_v30  ;;  %v271_v62 = vmul.f32 %v263_v18, %v947_v54 }
  0xfa   :  { %v272_v16 = vmul.f32 %v1038_v26, %v264_v48  ;;  %v273_v53 = vmul.f32 %v1038_v26, %v265_v13  ;;  %v274_v58 = vmul.f32 %v1038_v26, %v266_v45  ;;  %v275_v60 = vmul.f32 %v1038_v26, %v267_v40 }
  0xfb   :  { %v276_v21 = vmul.f32 %v1038_v26, %v268_v14  ;;  %v277_v0 = vmul.f32 %v1038_v26, %v269_v15  ;;  %v278_v59 = vmul.f32 %v1038_v26, %v270_v4  ;;  %v279_v17 = vmul.f32 %v1038_v26, %v271_v62 }
  0xfc   :  { %v280_v6 = vadd.f32 %v1043_v28, %v272_v16  ;;  %v281_v30 = vadd.f32 %v1043_v28, %v273_v53  ;;  %v282_v54 = vadd.f32 %v1043_v28, %v274_v58  ;;  %v283_v5 = vadd.f32 %v1043_v28, %v275_v60 }
  0xfd   :  { %v284_v51 = vadd.f32 %v1043_v28, %v276_v21  ;;  %649 = vrsqrt.f32 %v356_v9  ;;  %v285_v23 = vadd.f32 %v1043_v28, %v277_v0  ;;  %v286_v10 = vadd.f32 %v1043_v28, %v278_v59 }
  0xfe   :  { %288 = vst.msk [vmem:[%s1168_s10] sm:$0xff] %vm185_vm4, %v280_v6  ;;  %v287_v24 = vadd.f32 %v1043_v28, %v279_v17  ;;  %vm363_vm1 = vweird.f32 %v356_v9 }
  0xff   :  { %289 = vst.msk [vmem:[%s1168_s10 + $0x8] sm:$0xff] %vm185_vm4, %v281_v30 }
 0x100   :  { %290 = vst.msk [vmem:[%s1168_s10 + $0x10] sm:$0xff] %vm185_vm4, %v282_v54 }
 0x101   :  { %291 = vst.msk [vmem:[%s1168_s10 + $0x18] sm:$0xff] %vm185_vm4, %v283_v5 }
 0x102   :  { %292 = vst.msk [vmem:[%s1168_s10 + $0x20] sm:$0xff] %vm185_vm4, %v284_v51 }
 0x103   :  { %293 = vst.msk [vmem:[%s1168_s10 + $0x28] sm:$0xff] %vm185_vm4, %v285_v23  ;;  %v650_v22 = vpop.eup %649 }
 0x104   :  { %294 = vst.msk [vmem:[%s1168_s10 + $0x30] sm:$0xff] %vm185_vm4, %v286_v10  ;;  %v358_v25 = vmul.f32 %v650_v22, %v356_v9  ;;  %vm364_vm0 = vweird.f32 %v650_v22 }
 0x105   :  { %295 = vst.msk [vmem:[%s1168_s10 + $0x38] sm:$0xff] %vm185_vm4, %v287_v24  ;;  %vm365_vm2 = vmor %vm363_vm1, %vm364_vm0 }
 0x106   :  { %v359_v27 = vmul.f32 %v650_v22, %v358_v25 }
 0x108   :  { %v360_v31 = vmul.f32 0.5, %v359_v27 }
 0x10a   :  { %v361_v20 = vsub.f32 1.5, %v360_v31 }
 0x10c   :  { %v362_v34 = vmul.f32 %v650_v22, %v361_v20 }
 0x10e   :  { %v366_v32 = vsel %vm365_vm2, %v650_v22, %v362_v34 }
 0x10f   :  { %v367_v35 = vmul.f32 %v366_v32, %v972_v1  ;;  %v368_v33 = vmul.f32 %v366_v32, %v975_v50  ;;  %v369_v36 = vmul.f32 %v366_v32, %v978_v63  ;;  %v370_v37 = vmul.f32 %v366_v32, %v981_v7 }
 0x110   :  { %v371_v39 = vmul.f32 %v366_v32, %v990_v41  ;;  %v372_v43 = vmul.f32 %v366_v32, %v997_v44  ;;  %v373_v29 = vmul.f32 %v366_v32, %v1006_v19  ;;  %v374_v47 = vmul.f32 %v366_v32, %v1020_v12 }
 0x111   :  { %v375_v49 = vmul.f32 %v1038_v26, %v367_v35  ;;  %v376_v52 = vmul.f32 %v1038_v26, %v368_v33  ;;  %v377_v1 = vmul.f32 %v1038_v26, %v369_v36  ;;  %v378_v50 = vmul.f32 %v1038_v26, %v370_v37 }
 0x112   :  { %v379_v63 = vmul.f32 %v1038_v26, %v371_v39  ;;  %v380_v7 = vmul.f32 %v1038_v26, %v372_v43  ;;  %v381_v41 = vmul.f32 %v1038_v26, %v373_v29  ;;  %v382_v55 = vmul.f32 %v1038_v26, %v374_v47 }
 0x113   :  { %v383_v44 = vadd.f32 %v1043_v28, %v375_v49  ;;  %v384_v19 = vadd.f32 %v1043_v28, %v376_v52  ;;  %v385_v12 = vadd.f32 %v1043_v28, %v377_v1  ;;  %v386_v56 = vadd.f32 %v1043_v28, %v378_v50 }
 0x114   :  { %v387_v46 = vadd.f32 %v1043_v28, %v379_v63  ;;  %v388_v57 = vadd.f32 %v1043_v28, %v380_v7  ;;  %v389_v38 = vadd.f32 %v1043_v28, %v381_v41  ;;  %v390_v61 = vadd.f32 %v1043_v28, %v382_v55 }
 0x115   :  { %599 = vst.msk [vmem:[%s1168_s10 + $0x40] sm:$0xff] %vm185_vm4, %v383_v44 }
 0x116   :  { %600 = vst.msk [vmem:[%s1168_s10 + $0x48] sm:$0xff] %vm185_vm4, %v384_v19 }
 0x117   :  { %601 = vst.msk [vmem:[%s1168_s10 + $0x50] sm:$0xff] %vm185_vm4, %v385_v12 }
 0x118   :  { %602 = vst.msk [vmem:[%s1168_s10 + $0x58] sm:$0xff] %vm185_vm4, %v386_v56 }
 0x119   :  { %603 = vst.msk [vmem:[%s1168_s10 + $0x60] sm:$0xff] %vm185_vm4, %v387_v46 }
 0x11a   :  { %604 = vst.msk [vmem:[%s1168_s10 + $0x68] sm:$0xff] %vm185_vm4, %v388_v57 }
 0x11b   :  { %605 = vst.msk [vmem:[%s1168_s10 + $0x70] sm:$0xff] %vm185_vm4, %v389_v38 }
 0x11c   :  { %606 = vst.msk [vmem:[%s1168_s10 + $0x78] sm:$0xff] %vm185_vm4, %v390_v61 }

// kernel: deformable_detr_forward.3
= control target key start
LH: loop header
LB: loop body
LE: loop exit
PB: predicated region body
PF: predicated region fallthrough
CT: control target
= control target key end

     0   :  { %vm71_vm0 = vcmask 261120   ;;  %v861_v24 = vmov 0.0   ;;  %s862_s30 = smov 100   ;;  %vm640_vm13 = vcmask 130048   ;;  %s1275_s2 = inlined_call_operand.vmem [shape: bf16[32,49], index: 2, kind: input, shape index: {}]   ;;  %s1276_s3 = inlined_call_operand.vmem [shape: f32[1,49], index: 3, kind: input, shape index: {}]   ;;  %s1277_s0 = inlined_call_operand.vmem [shape: bf16[48,32], index: 0, kind: input, shape index: {}]   ;;  %s1278_s4 = inlined_call_operand.vmem [shape: bf16[32,32], index: 4, kind: input, shape index: {}]   ;;  %s1279_s5 = inlined_call_operand.vmem [shape: f32[1,32], index: 5, kind: input, shape index: {}]   ;;  %s1280_s8 = inlined_call_operand.vmem [shape: f32[48,128], index: 8, kind: output, shape index: {}]   ;;  %s1281_s7 = inlined_call_operand.vmem [shape: f32[1,4], index: 7, kind: input, shape index: {}]   ;;  %s1282_s6 = inlined_call_operand.vmem [shape: bf16[32,4], index: 6, kind: input, shape index: {}]   ;;  %s1283_s1 = inlined_call_operand.vmem [shape: f32[48,4], index: 1, kind: input, shape index: {}]  }
   0x1   :  { %v774_v0 = vld [vmem:[%s1275_s2 + $0x8] sm:$0xff]  ;;  %v773_v1 = vld [vmem:[%s1275_s2] sm:$0xff]  ;;  %v772_v4 = vld [vmem:[%s1277_s0 + $0x10] sm:$0xff]  ;;  %614 = vst [vmem:[%s1280_s8 + $0x20] sm:$0xff] %v861_v24 }
   0x2   :  { %87 = vmatpush.bf16.msra.mxu0 %v774_v0  ;;  %779 = vmatpush.bf16.msra.mxu3 %v774_v0  ;;  %v770_v2 = vld [vmem:[%s1277_s0] sm:$0xff]  ;;  %v771_v3 = vld [vmem:[%s1277_s0 + $0x8] sm:$0xff]  ;;  %s860_s0 = smov 96   ;;  %610 = vst [vmem:[%s1280_s8] sm:$0xff] %v861_v24 }
   0x3   :  { %v776_v5 = vld [vmem:[%s1278_s4 + $0x8] sm:$0xff]  ;;  %v775_v6 = vld [vmem:[%s1278_s4] sm:$0xff]  ;;  %611 = vst [vmem:[%s1280_s8 + $0x8] sm:$0xff] %v861_v24 }
   0x4   :  { %263 = vmatpush.bf16.msra.mxu1 %v776_v5  ;;  %v936_v7 = vld [vmem:[%s1276_s3] ss:$0 sm:$0xff]  ;;  %612 = vst [vmem:[%s1280_s8 + $0x10] sm:$0xff] %v861_v24  ;;  %v778_v5 = vld [vmem:[%s1282_s6 + $0x8] sm:$0xff] }
   0x5   :  { %613 = vst [vmem:[%s1280_s8 + $0x18] sm:$0xff] %v861_v24  ;;  %325 = vmatpush.bf16.msra.mxu2 %v778_v5 }
   0x6   :  { %88 = vmatpush.bf16.msra.mxu0 %v773_v1  ;;  %780 = vmatpush.bf16.msra.mxu3 %v773_v1  ;;  %615 = vst [vmem:[%s1280_s8 + $0x28] sm:$0xff] %v861_v24 }
   0x8   :  { %264 = vmatpush.bf16.msra.mxu1 %v775_v6 }
   0x9   :  { %733 = vmatmul.msk.bf16.vlgmr.msra.gmra.mxu0 %vm71_vm0, %v770_v2  ;;  %734 = vmatmul.msk.bf16.vlgmr.msra.gmra.mxu3 %vm71_vm0, %v771_v3 }
  0x19   :  { %735 = vmatmul.msk.bf16.gmra.mxu3 %vm71_vm0, %v772_v4 }
  0x86   :  { %v90_v8 = vpop.f32.mrf.mxu0 }
  0x87   :  { %v91_v9 = vadd.f32 %v936_v7, %v90_v8  ;;  %v777_v8 = vld [vmem:[%s1282_s6] sm:$0xff] }
  0x88   :  { %326 = vmatpush.bf16.msra.mxu2 %v777_v8  ;;  %v348_v8 = vld [vmem:[%s1283_s1 + $0x28] sm:$0xff] }
  0x89   :  { %v736_v10 = vmul.f32 -1.442695, %v91_v9  ;;  %622 = vrot.lane.b32.xlu0 %v91_v9, %s860_s0  ;;  %v105_v17 = vmax.f32 %v91_v9, 0.0 }
  0x8b   :  { %788 = vpow2.f32 %v736_v10 }
  0x8c   :  { %v95_v11 = vpop.f32.mrf.mxu3 }
  0x8d   :  { %v96_v12 = vadd.f32 %v936_v7, %v95_v11 }
  0x8e   :  { %v92_v13 = vpop.f32.mrf.mxu0 }
  0x8f   :  { %v738_v14 = vmul.f32 -1.442695, %v96_v12  ;;  %v93_v15 = vadd.f32 %v936_v7, %v92_v13  ;;  %626 = vrot.lane.b32.xlu1 %v96_v12, %s860_s0  ;;  %v107_v36 = vmax.f32 %v96_v12, 0.0 }
  0x91   :  { %v789_v16 = vpop.eup %788  ;;  %790 = vpow2.f32 %v738_v14  ;;  %v106_v18 = vmax.f32 %v93_v15, 0.0  ;;  %v737_v19 = vmul.f32 -1.442695, %v93_v15  ;;  %624 = vrot.lane.b32.xlu0 %v93_v15, %s860_s0  ;;  %v786_v14 = vld [vmem:[%s1279_s5] ss:$0 sm:$0xff] }
  0x92   :  { %v129_v20 = vadd.f32 1.0, %v789_v16 }
  0x93   :  { %792 = vpow2.f32 %v737_v19  ;;  %v225_v21 = vpack.c.bf16 %v106_v18, %v105_v17 }
  0x94   :  { %794 = vrcp.f32 %v129_v20  ;;  %v97_v22 = vpop.f32.mrf.mxu3  ;;  %v144_v34 = vand.u32 2147483647, %v129_v20  ;;  %v146_v35 = vand.u32 2147483648, %v129_v20  ;;  %vm140_vm2 = vweird.f32 %v129_v20 }
  0x95   :  { %v945_v23 = vadd.f32 %v936_v7, %v97_v22  ;;  %750 = vmatmul.msk.bf16.vlgmr.msra.gmra.mxu1 %vm71_vm0, %v225_v21 }
  0x96   :  { %vm145_vm4 = vcmp.eq.f32.partialorder %v144_v34, 8.507059e+37  ;;  %v147_v43 = vor.u32 1.1754944e-38, %v146_v35 }
  0x97   :  { %v791_v25 = vpop.eup %790  ;;  %628 = vrot.lane.b32.xlu1 %v945_v23, %s860_s0  ;;  %v108_v37 = vmax.f32 %v945_v23, 0.0 }
  0x98   :  { %v131_v26 = vadd.f32 1.0, %v791_v25 }
  0x99   :  { %v793_v27 = vpop.eup %792  ;;  %v226_v45 = vpack.c.bf16 %v108_v37, %v107_v36  ;;  %v343_v37 = vld [vmem:[%s1283_s1] sm:$0xff] }
  0x9a   :  { %v795_v28 = vpop.eup %794  ;;  %796 = vrcp.f32 %v131_v26  ;;  %v130_v29 = vadd.f32 1.0, %v793_v27  ;;  %vm170_vm5 = vweird.f32 %v131_v26  ;;  %v176_v57 = vand.u32 2147483648, %v131_v26 }
  0x9b   :  { %v136_v30 = vmul.f32 %v795_v28, %v129_v20  ;;  %vm141_vm1 = vweird.f32 %v795_v28  ;;  %v174_v59 = vand.u32 2147483647, %v131_v26 }
  0x9c   :  { %798 = vrcp.f32 %v130_v29  ;;  %v100_v31 = vpop.f32.mrf.mxu3  ;;  %vm142_vm3 = vmor %vm140_vm2, %vm141_vm1  ;;  %v161_v53 = vand.u32 2147483648, %v130_v29  ;;  %v159_v55 = vand.u32 2147483647, %v130_v29  ;;  %vm155_vm8 = vweird.f32 %v130_v29 }
  0x9d   :  { %v969_v32 = vadd.f32 %v936_v7, %v100_v31  ;;  %v137_v33 = vsub.f32 1.0, %v136_v30  ;;  %v177_v0 = vor.u32 1.1754944e-38, %v176_v57  ;;  %vm175_vm12 = vcmp.eq.f32.partialorder %v174_v59, 8.507059e+37  ;;  %v347_v59 = vld [vmem:[%s1283_s1 + $0x20] sm:$0xff] }
  0x9e   :  { %v162_v60 = vor.u32 1.1754944e-38, %v161_v53  ;;  %vm160_vm11 = vcmp.eq.f32.partialorder %v159_v55, 8.507059e+37 }
  0x9f   :  { %630 = vrot.lane.b32.xlu2 %v969_v32, %s860_s0  ;;  %v138_v38 = vmul.f32 %v795_v28, %v137_v33  ;;  %v109_v2 = vmax.f32 %v969_v32, 0.0 }
  0xa0   :  { %v797_v39 = vpop.eup %796 }
  0xa1   :  { %v139_v40 = vadd.f32 %v795_v28, %v138_v38  ;;  %v166_v41 = vmul.f32 %v797_v39, %v131_v26  ;;  %vm171_vm6 = vweird.f32 %v797_v39  ;;  %v349_v38 = vmax.f32 %v343_v37, 0.0 }
  0xa2   :  { %v799_v42 = vpop.eup %798  ;;  %vm172_vm9 = vmor %vm170_vm5, %vm171_vm6 }
  0xa3   :  { %v143_v44 = vsel %vm142_vm3, %v795_v28, %v139_v40  ;;  %v151_v46 = vmul.f32 %v799_v42, %v130_v29  ;;  %v167_v47 = vsub.f32 1.0, %v166_v41  ;;  %vm156_vm7 = vweird.f32 %v799_v42  ;;  %v344_v40 = vld [vmem:[%s1283_s1 + $0x8] sm:$0xff] }
  0xa4   :  { %v102_v48 = vpop.f32.mrf.mxu3  ;;  %v148_v49 = vsel %vm145_vm4, %v147_v43, %v143_v44  ;;  %vm157_vm10 = vmor %vm155_vm8, %vm156_vm7 }
  0xa5   :  { %v975_v50 = vadd.f32 %v936_v7, %v102_v48  ;;  %684 = vrot.lane.b32.xlu0 %v148_v49, %s862_s30  ;;  %751 = vmatmul.msk.bf16.gmra.mxu1 %vm71_vm0, %v226_v45  ;;  %v152_v51 = vsub.f32 1.0, %v151_v46  ;;  %v168_v52 = vmul.f32 %v797_v39, %v167_v47  ;;  %v345_v45 = vld [vmem:[%s1283_s1 + $0x10] sm:$0xff] }
  0xa6   :  { %v351_v46 = vmax.f32 %v345_v45, 0.0 }
  0xa7   :  { %632 = vrot.lane.b32.xlu2 %v975_v50, %s860_s0  ;;  %v153_v54 = vmul.f32 %v799_v42, %v152_v51  ;;  %v169_v56 = vadd.f32 %v797_v39, %v168_v52  ;;  %v110_v3 = vmax.f32 %v975_v50, 0.0  ;;  %v346_v51 = vld [vmem:[%s1283_s1 + $0x18] sm:$0xff] }
  0xa8   :  { %v1028_v48 = vmin.f32 %v351_v46, 1.0 }
  0xa9   :  { %v154_v58 = vadd.f32 %v799_v42, %v153_v54  ;;  %v173_v62 = vsel %vm172_vm9, %v797_v39, %v169_v56  ;;  %v227_v4 = vpack.c.bf16 %v110_v3, %v109_v2  ;;  %v355_v39 = vmin.f32 %v349_v38, 1.0 }
  0xaa   :  { %v178_v1 = vsel %vm175_vm12, %v177_v0, %v173_v62  ;;  %v369_v53 = vsub.f32 1.0, %v1028_v48  ;;  %v352_v54 = vmax.f32 %v346_v51, 0.0  ;;  %v353_v62 = vmax.f32 %v347_v59, 0.0 }
  0xab   :  { %v158_v61 = vsel %vm157_vm10, %v799_v42, %v154_v58  ;;  %v367_v41 = vsub.f32 1.0, %v355_v39  ;;  %v350_v42 = vmax.f32 %v344_v40, 0.0  ;;  %v363_v51 = vmax.f32 %v1028_v48, 1e-05 }
  0xac   :  { %v163_v63 = vsel %vm160_vm11, %v162_v60, %v158_v61  ;;  %v1034_v56 = vmax.f32 %v369_v53, 1e-05  ;;  %v1036_v57 = vmin.f32 %v352_v54, 1.0  ;;  %v1045_v3 = vmin.f32 %v353_v62, 1.0 }
  0xad   :  { %686 = vrot.lane.b32.xlu1 %v163_v63, %s862_s30  ;;  %v373_v43 = vmax.f32 %v367_v41, 1e-05  ;;  %v1022_v44 = vmin.f32 %v350_v42, 1.0 }
  0xae   :  { %v370_v61 = vsub.f32 1.0, %v1036_v57  ;;  %vm414_vm6 = vweird.f32 %v1034_v56  ;;  %v418_v38 = vand.u32 2147483647, %v1034_v56 }
  0xaf   :  { %688 = vrot.lane.b32.xlu2 %v178_v1, %s862_s30  ;;  %800 = vrcp.f32 %v373_v43  ;;  %v368_v47 = vsub.f32 1.0, %v1022_v44  ;;  %vm384_vm14 = vweird.f32 %v373_v43  ;;  %v390_v1 = vand.u32 2147483648, %v373_v43 }
  0xb0   :  { %v1043_v2 = vmax.f32 %v370_v61, 1e-05  ;;  %vm419_vm9 = vcmp.eq.f32.partialorder %v418_v38, 8.507059e+37 }
  0xb1   :  { %v374_v49 = vmax.f32 %v368_v47, 1e-05 }
  0xb2   :  { %vm429_vm10 = vweird.f32 %v1043_v2  ;;  %v435_v54 = vand.u32 2147483648, %v1043_v2 }
  0xb3   :  { %802 = vrcp.f32 %v374_v49  ;;  %vm399_vm2 = vweird.f32 %v374_v49 }
  0xb4   :  { %804 = vrcp.f32 %v1034_v56 }
  0xb5   :  { %752 = vmatmul.msk.bf16.gmra.mxu1 %vm71_vm0, %v227_v4  ;;  %v801_v52 = vpop.eup %800  ;;  %806 = vrcp.f32 %v1043_v2 }
  0xb6   :  { %v380_v55 = vmul.f32 %v801_v52, %v373_v43  ;;  %vm385_vm15 = vweird.f32 %v801_v52 }
  0xb8   :  { %v381_v58 = vsub.f32 1.0, %v380_v55 }
  0xb9   :  { %v803_v60 = vpop.eup %802 }
  0xba   :  { %v382_v63 = vmul.f32 %v801_v52, %v381_v58  ;;  %v395_v0 = vmul.f32 %v803_v60, %v374_v49  ;;  %v805_v4 = vpop.eup %804  ;;  %vm400_vm3 = vweird.f32 %v803_v60  ;;  %v433_v58 = vand.u32 2147483647, %v1043_v2 }
  0xbb   :  { %vm1059_vm4 = vmor %vm399_vm2, %vm400_vm3  ;;  %vm415_vm7 = vweird.f32 %v805_v4 }
  0xbc   :  { %v383_v5 = vadd.f32 %v801_v52, %v382_v63  ;;  %vm416_vm8 = vmor %vm414_vm6, %vm415_vm7 }
  0xf9   :  { %v631_v6 = vpop.permute.xlu2 %630 }
  0xfa   :  { %645 = vst.msk [vmem:[%s1280_s8 + $0x20] sm:$0xff] %vm640_vm13, %v631_v6  ;;  %v388_v6 = vand.u32 2147483647, %v373_v43 }
  0xfb   :  { %v623_v7 = vpop.permute.xlu0 %622 }
  0xfc   :  { %641 = vst.msk [vmem:[%s1280_s8] sm:$0xff] %vm640_vm13, %v623_v7  ;;  %v396_v7 = vsub.f32 1.0, %v395_v0  ;;  %vm389_vm1 = vcmp.eq.f32.partialorder %v388_v6, 8.507059e+37  ;;  %v436_v0 = vor.u32 1.1754944e-38, %v435_v54 }
 0x101   :  { %v633_v9 = vpop.permute.xlu2 %632  ;;  %v627_v10 = vpop.permute.xlu1 %626 }
 0x102   :  { %646 = vst.msk [vmem:[%s1280_s8 + $0x28] sm:$0xff] %vm640_vm13, %v633_v9  ;;  %v354_v9 = vmax.f32 %v348_v8, 0.0  ;;  %v364_v8 = vmax.f32 %v1036_v57, 1e-05 }
 0x103   :  { %643 = vst.msk [vmem:[%s1280_s8 + $0x10] sm:$0xff] %vm640_vm13, %v627_v10  ;;  %v625_v11 = vpop.permute.xlu0 %624  ;;  %v391_v10 = vor.u32 1.1754944e-38, %v390_v1 }
 0x104   :  { %642 = vst.msk [vmem:[%s1280_s8 + $0x8] sm:$0xff] %vm640_vm13, %v625_v11  ;;  %v410_v11 = vmul.f32 %v805_v4, %v1034_v56 }
 0x109   :  { %v629_v12 = vpop.permute.xlu1 %628 }
 0x10a   :  { %644 = vst.msk [vmem:[%s1280_s8 + $0x18] sm:$0xff] %vm640_vm13, %v629_v12  ;;  %v371_v12 = vsub.f32 1.0, %v1045_v3 }
 0x112   :  { %v266_v13 = vpop.f32.mrf.mxu1 }
 0x113   :  { %v267_v15 = vadd.f32 %v786_v14, %v266_v13 }
 0x115   :  { %v281_v18 = vmax.f32 %v267_v15, 0.0  ;;  %v361_v15 = vmax.f32 %v355_v39, 1e-05  ;;  %v481_v39 = vlaneseq }
 0x117   :  { %v1078_v46 = vand.u32 127, %v481_v39 }
 0x119   :  { %vm483_vm12 = vcmp.lt.s32.totalorder %v1078_v46, 2 }
 0x11a   :  { %v268_v16 = vpop.f32.mrf.mxu1 }
 0x11b   :  { %v269_v17 = vadd.f32 %v786_v14, %v268_v16  ;;  %v1053_v16 = vmin.f32 %v354_v9, 1.0 }
 0x11d   :  { %v282_v19 = vmax.f32 %v269_v17, 0.0 }
 0x11f   :  { %v287_v20 = vpack.c.bf16 %v282_v19, %v281_v18  ;;  %v405_v18 = vand.u32 2147483648, %v374_v49  ;;  %v411_v19 = vsub.f32 1.0, %v410_v11 }
 0x121   :  { %761 = vmatmul.msk.bf16.vlgmr.msra.gmra.mxu2 %vm71_vm0, %v287_v20  ;;  %v1055_v20 = vmax.f32 %v371_v12, 1e-05 }
 0x122   :  { %v271_v21 = vpop.f32.mrf.mxu1 }
 0x123   :  { %v272_v22 = vadd.f32 %v786_v14, %v271_v21  ;;  %808 = vrcp.f32 %v1055_v20  ;;  %v450_v11 = vand.u32 2147483648, %v1055_v20 }
 0x125   :  { %v283_v26 = vmax.f32 %v272_v22, 0.0  ;;  %v403_v22 = vand.u32 2147483647, %v374_v49 }
 0x127   :  { %vm404_vm5 = vcmp.eq.f32.partialorder %v403_v22, 8.507059e+37  ;;  %v451_v22 = vor.u32 1.1754944e-38, %v450_v11 }
 0x12a   :  { %v273_v24 = vpop.f32.mrf.mxu1 }
 0x12b   :  { %v274_v25 = vadd.f32 %v786_v14, %v273_v24  ;;  %v1057_v24 = vpop.eup %806 }
 0x12c   :  { %v1075_v41 = vpop.eup %808  ;;  %vm430_vm11 = vweird.f32 %v1057_v24 }
 0x12d   :  { %v284_v27 = vmax.f32 %v274_v25, 0.0  ;;  %v440_v49 = vmul.f32 %v1075_v41, %v1055_v20  ;;  %vm1097_vm13 = vmor %vm429_vm10, %vm430_vm11 }
 0x12f   :  { %v288_v28 = vpack.c.bf16 %v284_v27, %v283_v26  ;;  %v372_v27 = vsub.f32 1.0, %v1053_v16  ;;  %v441_v59 = vsub.f32 1.0, %v440_v49 }
 0x131   :  { %762 = vmatmul.msk.bf16.gmra.mxu2 %vm71_vm0, %v288_v28  ;;  %v406_v28 = vor.u32 1.1754944e-38, %v405_v18  ;;  %v442_v6 = vmul.f32 %v1075_v41, %v441_v59 }
 0x132   :  { %v276_v29 = vpop.f32.mrf.mxu1 }
 0x133   :  { %v277_v30 = vadd.f32 %v786_v14, %v276_v29  ;;  %v412_v29 = vmul.f32 %v805_v4, %v411_v19 }
 0x135   :  { %v285_v34 = vmax.f32 %v277_v30, 0.0  ;;  %v413_v37 = vadd.f32 %v805_v4, %v412_v29 }
 0x137   :  { %v417_v45 = vsel %vm416_vm8, %v805_v4, %v413_v37 }
 0x13a   :  { %v278_v31 = vpop.f32.mrf.mxu1 }
 0x13b   :  { %v279_v33 = vadd.f32 %v786_v14, %v278_v31  ;;  %v397_v14 = vmul.f32 %v803_v60, %v396_v7  ;;  %v425_v31 = vmul.f32 %v1057_v24, %v1043_v2 }
 0x13d   :  { %v286_v35 = vmax.f32 %v279_v33, 0.0  ;;  %v398_v21 = vadd.f32 %v803_v60, %v397_v14  ;;  %v362_v33 = vmax.f32 %v1022_v44, 1e-05  ;;  %v426_v40 = vsub.f32 1.0, %v425_v31 }
 0x13e   :  { %v443_v14 = vadd.f32 %v1075_v41, %v442_v6 }
 0x13f   :  { %v289_v36 = vpack.c.bf16 %v286_v35, %v285_v34  ;;  %v402_v30 = vsel %vm1059_vm4, %v803_v60, %v398_v21  ;;  %v420_v34 = vand.u32 2147483648, %v1034_v56  ;;  %v1072_v35 = vmax.f32 %v372_v27, 1e-05  ;;  %v1092_v56 = vld [vmem:[%s1281_s7] ss:$0 sm:$0xff]  ;;  %s863_s7 = smov 16  }
 0x140   :  { %v427_v47 = vmul.f32 %v1057_v24, %v426_v40  ;;  %v365_v27 = vmax.f32 %v1045_v3, 1e-05 }
 0x141   :  { %763 = vmatmul.msk.bf16.gmra.mxu2 %vm71_vm0, %v289_v36  ;;  %vm386_vm0 = vmor %vm384_vm14, %vm385_vm15  ;;  %v407_v36 = vsel %vm404_vm5, %v406_v28, %v402_v30  ;;  %v421_v43 = vor.u32 1.1754944e-38, %v420_v34  ;;  %vm434_vm14 = vcmp.eq.f32.partialorder %v433_v58, 8.507059e+37  ;;  %vm444_vm15 = vweird.f32 %v1055_v20 }
 0x142   :  { %v387_v13 = vsel %vm386_vm0, %v801_v52, %v383_v5  ;;  %v408_v42 = vmul.f32 %v407_v36, %v362_v33  ;;  %v428_v48 = vadd.f32 %v1057_v24, %v427_v47  ;;  %vm445_vm0 = vweird.f32 %v1075_v41 }
 0x143   :  { %v392_v17 = vsel %vm389_vm1, %v391_v10, %v387_v13  ;;  %v422_v52 = vsel %vm419_vm9, %v421_v43, %v417_v45  ;;  %vm1116_vm1 = vmor %vm444_vm15, %vm445_vm0  ;;  %vm459_vm3 = vweird.f32 %v1072_v35  ;;  %v465_v28 = vand.u32 2147483648, %v1072_v35 }
 0x144   :  { %v393_v26 = vmul.f32 %v392_v17, %v361_v15  ;;  %v423_v60 = vmul.f32 %v422_v52, %v363_v51  ;;  %v432_v2 = vsel %vm1097_vm13, %v1057_v24, %v428_v48  ;;  %v448_v15 = vand.u32 2147483647, %v1055_v20 }
 0x145   :  { %v437_v10 = vsel %vm434_vm14, %v436_v0, %v432_v2  ;;  %v447_v20 = vsel %vm1116_vm1, %v1075_v41, %v443_v14  ;;  %v463_v33 = vand.u32 2147483647, %v1072_v35  ;;  %v466_v40 = vor.u32 1.1754944e-38, %v465_v28 }
 0x146   :  { %810 = vlog2.f32 %v393_v26  ;;  %v438_v57 = vmul.f32 %v437_v10, %v364_v8  ;;  %vm449_vm2 = vcmp.eq.f32.partialorder %v448_v15, 8.507059e+37  ;;  %v739_v43 = vmul.f32 -1.442695, %v945_v23 }
 0x147   :  { %812 = vrcp.f32 %v1072_v35  ;;  %v452_v30 = vsel %vm449_vm2, %v451_v22, %v447_v20  ;;  %vm464_vm6 = vcmp.eq.f32.partialorder %v463_v33, 8.507059e+37 }
 0x148   :  { %814 = vlog2.f32 %v408_v42  ;;  %v453_v39 = vmul.f32 %v452_v30, %v365_v27 }
 0x149   :  { %816 = vlog2.f32 %v423_v60 }
 0x14c   :  { %v811_v44 = vpop.eup %810 }
 0x14d   :  { %v470_v53 = vmul.f32 0.6931472, %v811_v44  ;;  %v1087_v55 = vpop.eup %812  ;;  %v366_v44 = vmax.f32 %v1053_v16, 1e-05 }
 0x14e   :  { %v455_v1 = vmul.f32 %v1087_v55, %v1072_v35  ;;  %v815_v4 = vpop.eup %814  ;;  %vm460_vm4 = vweird.f32 %v1087_v55 }
 0x14f   :  { %v484_v63 = vsel %vm483_vm12, %v470_v53, 0.0  ;;  %v472_v9 = vmul.f32 0.6931472, %v815_v4  ;;  %v817_v18 = vpop.eup %816  ;;  %vm1133_vm5 = vmor %vm459_vm3, %vm460_vm4 }
 0x150   :  { %v456_v12 = vsub.f32 1.0, %v455_v1  ;;  %v474_v29 = vmul.f32 0.6931472, %v817_v18 }
 0x151   :  { %v485_v21 = vsel %vm483_vm12, %v472_v9, 0.0 }
 0x152   :  { %v457_v24 = vmul.f32 %v1087_v55, %v456_v12  ;;  %v486_v41 = vsel %vm483_vm12, %v474_v29, 0.0 }
 0x154   :  { %v458_v31 = vadd.f32 %v1087_v55, %v457_v24 }
 0x156   :  { %v462_v42 = vsel %vm1133_vm5, %v1087_v55, %v458_v31 }
 0x157   :  { %v467_v49 = vsel %vm464_vm6, %v466_v40, %v462_v42 }
 0x158   :  { %v468_v58 = vmul.f32 %v467_v49, %v366_v44 }
 0x1a4   :  { %v328_v62 = vpop.f32.mrf.mxu2 }
 0x1a5   :  { %v329_v5 = vadd.f32 %v1092_v56, %v328_v62  ;;  %v740_v62 = vmul.f32 -1.442695, %v969_v32 }
 0x1a7   :  { %v490_v7 = vadd.f32 %v484_v63, %v329_v5 }
 0x1a9   :  { %v764_v13 = vmul.f32 -1.442695, %v490_v7 }
 0x1ab   :  { %818 = vpow2.f32 %v764_v13 }
 0x1ac   :  { %v330_v19 = vpop.f32.mrf.mxu2  ;;  %820 = vlog2.f32 %v438_v57 }
 0x1ad   :  { %v331_v25 = vadd.f32 %v1092_v56, %v330_v19 }
 0x1af   :  { %v491_v26 = vadd.f32 %v485_v21, %v331_v25  ;;  %v741_v21 = vmul.f32 -1.442695, %v975_v50 }
 0x1b1   :  { %v819_v34 = vpop.eup %818  ;;  %v765_v36 = vmul.f32 -1.442695, %v491_v26 }
 0x1b2   :  { %v514_v38 = vadd.f32 1.0, %v819_v34  ;;  %v821_v35 = vpop.eup %820 }
 0x1b3   :  { %822 = vpow2.f32 %v765_v36  ;;  %v476_v51 = vmul.f32 0.6931472, %v821_v35 }
 0x1b4   :  { %824 = vrcp.f32 %v514_v38  ;;  %v333_v3 = vpop.f32.mrf.mxu2  ;;  %v531_v63 = vand.u32 2147483648, %v514_v38  ;;  %v529_v5 = vand.u32 2147483647, %v514_v38  ;;  %vm525_vm8 = vweird.f32 %v514_v38 }
 0x1b5   :  { %v334_v45 = vadd.f32 %v1092_v56, %v333_v3  ;;  %826 = vlog2.f32 %v453_v39  ;;  %v487_v59 = vsel %vm483_vm12, %v476_v51, 0.0 }
 0x1b6   :  { %828 = vpow2.f32 %v739_v43  ;;  %v532_v32 = vor.u32 1.1754944e-38, %v531_v63  ;;  %vm530_vm10 = vcmp.eq.f32.partialorder %v529_v5, 8.507059e+37 }
 0x1b7   :  { %v492_v47 = vadd.f32 %v486_v41, %v334_v45 }
 0x1b9   :  { %v823_v52 = vpop.eup %822  ;;  %v766_v53 = vmul.f32 -1.442695, %v492_v47 }
 0x1ba   :  { %v825_v54 = vpop.eup %824  ;;  %v1145_v48 = vadd.f32 1.0, %v823_v52 }
 0x1bb   :  { %830 = vpow2.f32 %v766_v53  ;;  %v521_v55 = vmul.f32 %v825_v54, %v514_v38  ;;  %v827_v16 = vpop.eup %826  ;;  %vm526_vm7 = vweird.f32 %v825_v54 }
 0x1bc   :  { %832 = vrcp.f32 %v1145_v48  ;;  %v335_v23 = vpop.f32.mrf.mxu2  ;;  %v829_v0 = vpop.eup %828  ;;  %v478_v2 = vmul.f32 0.6931472, %v827_v16  ;;  %vm527_vm9 = vmor %vm525_vm8, %vm526_vm7  ;;  %v546_v22 = vand.u32 2147483648, %v1145_v48  ;;  %v544_v20 = vand.u32 2147483647, %v1145_v48 }
 0x1bd   :  { %v336_v60 = vadd.f32 %v1092_v56, %v335_v23  ;;  %v522_v61 = vsub.f32 1.0, %v521_v55  ;;  %834 = vlog2.f32 %v468_v58  ;;  %v1152_v10 = vadd.f32 1.0, %v829_v0 }
 0x1be   :  { %836 = vpow2.f32 %v740_v62  ;;  %v488_v17 = vsel %vm483_vm12, %v478_v2, 0.0  ;;  %vm540_vm13 = vweird.f32 %v1145_v48  ;;  %v547_v34 = vor.u32 1.1754944e-38, %v546_v22 }
 0x1bf   :  { %v493_v1 = vadd.f32 %v487_v59, %v336_v60  ;;  %v523_v4 = vmul.f32 %v825_v54, %v522_v61  ;;  %vm545_vm15 = vcmp.eq.f32.partialorder %v544_v20, 8.507059e+37  ;;  %vm185_vm8 = vweird.f32 %v1152_v10 }
 0x1c1   :  { %v831_v6 = vpop.eup %830  ;;  %v767_v7 = vmul.f32 -1.442695, %v493_v1  ;;  %v524_v8 = vadd.f32 %v825_v54, %v523_v4 }
 0x1c2   :  { %v833_v9 = vpop.eup %832  ;;  %v1154_v11 = vadd.f32 1.0, %v831_v6 }
 0x1c3   :  { %838 = vpow2.f32 %v767_v7  ;;  %v528_v12 = vsel %vm527_vm9, %v825_v54, %v524_v8  ;;  %v536_v13 = vmul.f32 %v833_v9, %v1145_v48  ;;  %v835_v14 = vpop.eup %834  ;;  %vm541_vm11 = vweird.f32 %v833_v9 }
 0x1c4   :  { %840 = vrcp.f32 %v1154_v11  ;;  %v338_v15 = vpop.f32.mrf.mxu2  ;;  %v533_v57 = vsel %vm530_vm10, %v532_v32, %v528_v12  ;;  %v837_v26 = vpop.eup %836  ;;  %v480_v27 = vmul.f32 0.6931472, %v835_v14  ;;  %vm542_vm14 = vmor %vm540_vm13, %vm541_vm11  ;;  %v561_v35 = vand.u32 2147483648, %v1154_v11 }
 0x1c5   :  { %v339_v18 = vadd.f32 %v1092_v56, %v338_v15  ;;  %653 = vrot.lane.b32.xlu0 %v533_v57, %s863_s7  ;;  %v537_v19 = vsub.f32 1.0, %v536_v13  ;;  %842 = vrcp.f32 %v1152_v10  ;;  %v1170_v38 = vadd.f32 1.0, %v837_v26 }
 0x1c6   :  { %844 = vpow2.f32 %v741_v21  ;;  %v489_v40 = vsel %vm483_vm12, %v480_v27, 0.0  ;;  %v559_v44 = vand.u32 2147483647, %v1154_v11  ;;  %vm555_vm12 = vweird.f32 %v1154_v11 }
 0x1c7   :  { %v494_v24 = vadd.f32 %v488_v17, %v339_v18  ;;  %v538_v25 = vmul.f32 %v833_v9, %v537_v19  ;;  %v562_v54 = vor.u32 1.1754944e-38, %v561_v35  ;;  %v191_v17 = vand.u32 2147483648, %v1152_v10 }
 0x1c8   :  { %vm560_vm2 = vcmp.eq.f32.partialorder %v559_v44, 8.507059e+37  ;;  %v189_v21 = vand.u32 2147483647, %v1152_v10 }
 0x1c9   :  { %v839_v28 = vpop.eup %838  ;;  %v768_v29 = vmul.f32 -1.442695, %v494_v24  ;;  %v539_v30 = vadd.f32 %v833_v9, %v538_v25 }
 0x1ca   :  { %v841_v31 = vpop.eup %840  ;;  %v517_v33 = vadd.f32 1.0, %v839_v28  ;;  %v192_v28 = vor.u32 1.1754944e-38, %v191_v17 }
 0x1cb   :  { %846 = vpow2.f32 %v768_v29  ;;  %v543_v50 = vsel %vm542_vm14, %v833_v9, %v539_v30  ;;  %v551_v36 = vmul.f32 %v841_v31, %v1154_v11  ;;  %v1168_v37 = vpop.eup %842  ;;  %vm556_vm0 = vweird.f32 %v841_v31 }
 0x1cc   :  { %848 = vrcp.f32 %v517_v33  ;;  %v340_v39 = vpop.f32.mrf.mxu2  ;;  %v548_v3 = vsel %vm545_vm15, %v547_v34, %v543_v50  ;;  %v845_v47 = vpop.eup %844  ;;  %v181_v46 = vmul.f32 %v1168_v37, %v1152_v10  ;;  %vm557_vm1 = vmor %vm555_vm12, %vm556_vm0  ;;  %v576_v61 = vand.u32 2147483648, %v517_v33 }
 0x1cd   :  { %v341_v41 = vadd.f32 %v1092_v56, %v340_v39  ;;  %655 = vrot.lane.b32.xlu1 %v548_v3, %s863_s7  ;;  %v552_v42 = vsub.f32 1.0, %v551_v36  ;;  %850 = vrcp.f32 %v1170_v38  ;;  %v1182_v55 = vadd.f32 1.0, %v845_v47 }
 0x1ce   :  { %v182_v59 = vsub.f32 1.0, %v181_v46  ;;  %v574_v63 = vand.u32 2147483647, %v517_v33  ;;  %vm570_vm4 = vweird.f32 %v517_v33  ;;  %v577_v7 = vor.u32 1.1754944e-38, %v576_v61 }
 0x1cf   :  { %v495_v43 = vadd.f32 %v489_v40, %v341_v41  ;;  %v553_v45 = vmul.f32 %v841_v31, %v552_v42  ;;  %vm186_vm7 = vweird.f32 %v1168_v37  ;;  %vm190_vm15 = vcmp.eq.f32.partialorder %v189_v21, 8.507059e+37 }
 0x1d0   :  { %v183_v0 = vmul.f32 %v1168_v37, %v182_v59  ;;  %vm575_vm6 = vcmp.eq.f32.partialorder %v574_v63, 8.507059e+37  ;;  %vm1198_vm10 = vmor %vm185_vm8, %vm186_vm7  ;;  %vm200_vm0 = vweird.f32 %v1170_v38  ;;  %v204_v3 = vand.u32 2147483647, %v1170_v38 }
 0x1d1   :  { %v847_v49 = vpop.eup %846  ;;  %v769_v51 = vmul.f32 -1.442695, %v495_v43  ;;  %v554_v52 = vadd.f32 %v841_v31, %v553_v45  ;;  %vm215_vm8 = vweird.f32 %v1182_v55 }
 0x1d2   :  { %v849_v56 = vpop.eup %848  ;;  %v518_v53 = vadd.f32 1.0, %v847_v49  ;;  %v184_v32 = vadd.f32 %v1168_v37, %v183_v0  ;;  %v221_v49 = vand.u32 2147483648, %v1182_v55 }
 0x1d3   :  { %852 = vpow2.f32 %v769_v51  ;;  %v558_v48 = vsel %vm557_vm1, %v841_v31, %v554_v52  ;;  %v566_v58 = vmul.f32 %v849_v56, %v517_v33  ;;  %v1185_v60 = vpop.eup %850  ;;  %vm571_vm3 = vweird.f32 %v849_v56 }
 0x1d4   :  { %854 = vrcp.f32 %v518_v53  ;;  %v563_v23 = vsel %vm560_vm2, %v562_v54, %v558_v48  ;;  %v196_v5 = vmul.f32 %v1185_v60, %v1170_v38  ;;  %vm572_vm5 = vmor %vm570_vm4, %vm571_vm3  ;;  %v591_v15 = vand.u32 2147483648, %v518_v53  ;;  %v689_v54 = vpop.permute.xlu2 %688  ;;  %v685_v48 = vpop.permute.xlu0 %684 }
 0x1d5   :  { %657 = vrot.lane.b32.xlu2 %v563_v23, %s863_s7  ;;  %v567_v16 = vsub.f32 1.0, %v566_v58  ;;  %856 = vrcp.f32 %v1182_v55  ;;  %v589_v18 = vand.u32 2147483647, %v518_v53  ;;  %v188_v22 = vsel %vm1198_vm10, %v1168_v37, %v184_v32 }
 0x1d6   :  { %v197_v13 = vsub.f32 1.0, %v196_v5  ;;  %vm585_vm11 = vweird.f32 %v518_v53  ;;  %v592_v27 = vor.u32 1.1754944e-38, %v591_v15  ;;  %v193_v31 = vsel %vm190_vm15, %v192_v28, %v188_v22 }
 0x1d7   :  { %v568_v62 = vmul.f32 %v849_v56, %v567_v16  ;;  %vm590_vm14 = vcmp.eq.f32.partialorder %v589_v18, 8.507059e+37  ;;  %vm201_vm12 = vweird.f32 %v1185_v60  ;;  %v206_v37 = vand.u32 2147483648, %v1170_v38 }
 0x1d8   :  { %v198_v25 = vmul.f32 %v1185_v60, %v197_v13  ;;  %vm202_vm2 = vmor %vm200_vm0, %vm201_vm12  ;;  %v219_v51 = vand.u32 2147483647, %v1182_v55 }
 0x1d9   :  { %v853_v1 = vpop.eup %852  ;;  %v569_v4 = vadd.f32 %v849_v56, %v568_v62  ;;  %v207_v45 = vor.u32 1.1754944e-38, %v206_v37 }
 0x1da   :  { %v855_v2 = vpop.eup %854  ;;  %v519_v6 = vadd.f32 1.0, %v853_v1  ;;  %v199_v34 = vadd.f32 %v1185_v60, %v198_v25  ;;  %vm220_vm10 = vcmp.eq.f32.partialorder %v219_v51, 8.507059e+37 }
 0x1db   :  { %v573_v8 = vsel %vm572_vm5, %v849_v56, %v569_v4  ;;  %v581_v9 = vmul.f32 %v855_v2, %v518_v53  ;;  %v1194_v14 = vpop.eup %856  ;;  %vm586_vm9 = vweird.f32 %v855_v2  ;;  %v222_v56 = vor.u32 1.1754944e-38, %v221_v49 }
 0x1dc   :  { %858 = vrcp.f32 %v519_v6  ;;  %v578_v11 = vsel %vm575_vm6, %v577_v7, %v573_v8  ;;  %v211_v20 = vmul.f32 %v1194_v14, %v1182_v55  ;;  %vm587_vm13 = vmor %vm585_vm11, %vm586_vm9  ;;  %v606_v36 = vand.u32 2147483648, %v519_v6  ;;  %v687_v55 = vpop.permute.xlu1 %686 }
 0x1dd   :  { %659 = vrot.lane.b32.xlu0 %v578_v11, %s863_s7  ;;  %v582_v12 = vsub.f32 1.0, %v581_v9  ;;  %v604_v40 = vand.u32 2147483647, %v519_v6  ;;  %vm600_vm3 = vweird.f32 %v519_v6  ;;  %v203_v42 = vsel %vm202_vm2, %v1185_v60, %v199_v34 }
 0x1de   :  { %v212_v50 = vsub.f32 1.0, %v211_v20  ;;  %v607_v43 = vor.u32 1.1754944e-38, %v606_v36  ;;  %vm205_vm6 = vcmp.eq.f32.partialorder %v204_v3, 8.507059e+37  ;;  %vm216_vm7 = vweird.f32 %v1194_v14 }
 0x1df   :  { %v583_v57 = vmul.f32 %v855_v2, %v582_v12  ;;  %vm605_vm5 = vcmp.eq.f32.partialorder %v604_v40, 8.507059e+37  ;;  %v208_v46 = vsel %vm205_vm6, %v207_v45, %v203_v42  ;;  %vm217_vm9 = vmor %vm215_vm8, %vm216_vm7  ;;  %vm671_vm11 = vcmask 162944  }
 0x1e0   :  { %v213_v35 = vmul.f32 %v1194_v14, %v212_v50 }
 0x1e1   :  { %v584_v24 = vadd.f32 %v855_v2, %v583_v57 }
 0x1e2   :  { %v859_v26 = vpop.eup %858  ;;  %v214_v38 = vadd.f32 %v1194_v14, %v213_v35 }
 0x1e3   :  { %v588_v29 = vsel %vm587_vm13, %v855_v2, %v584_v24  ;;  %v596_v30 = vmul.f32 %v859_v26, %v519_v6  ;;  %vm601_vm1 = vweird.f32 %v859_v26  ;;  %vm702_vm13 = vcmask 171168  }
 0x1e4   :  { %v593_v10 = vsel %vm590_vm14, %v592_v27, %v588_v29  ;;  %vm602_vm4 = vmor %vm600_vm3, %vm601_vm1  ;;  %v218_v52 = vsel %vm217_vm9, %v1194_v14, %v214_v38 }
 0x1e5   :  { %661 = vrot.lane.b32.xlu1 %v593_v10, %s863_s7  ;;  %690 = vrot.lane.b32.xlu0 %v193_v31, %s862_s30  ;;  %v597_v33 = vsub.f32 1.0, %v596_v30  ;;  %v223_v53 = vsel %vm220_vm10, %v222_v56, %v218_v52 }
 0x1e7   :  { %v598_v39 = vmul.f32 %v859_v26, %v597_v33 }
 0x1e9   :  { %v599_v41 = vadd.f32 %v859_v26, %v598_v39 }
 0x1eb   :  { %v603_v44 = vsel %vm602_vm4, %v859_v26, %v599_v41 }
 0x1ec   :  { %v608_v47 = vsel %vm605_vm5, %v607_v43, %v603_v44 }
 0x1ed   :  { %663 = vrot.lane.b32.xlu2 %v608_v47, %s863_s7  ;;  %692 = vrot.lane.b32.xlu1 %v208_v46, %s862_s30 }
 0x1f5   :  { %694 = vrot.lane.b32.xlu2 %v223_v53, %s862_s30 }
 0x22f   :  { %v658_v58 = vpop.permute.xlu2 %657 }
 0x230   :  { %674 = vst.msk [vmem:[%s1280_s8 + $0x10] sm:$0xff] %vm671_vm11, %v658_v58 }
 0x231   :  { %705 = vst.msk [vmem:[%s1280_s8 + $0x10] sm:$0xff] %vm702_vm13, %v689_v54 }
 0x237   :  { %v654_v23 = vpop.permute.xlu0 %653 }
 0x238   :  { %672 = vst.msk [vmem:[%s1280_s8] sm:$0xff] %vm671_vm11, %v654_v23 }
 0x239   :  { %703 = vst.msk [vmem:[%s1280_s8] sm:$0xff] %vm702_vm13, %v685_v48 }
 0x23f   :  { %v656_v59 = vpop.permute.xlu1 %655 }
 0x240   :  { %673 = vst.msk [vmem:[%s1280_s8 + $0x8] sm:$0xff] %vm671_vm11, %v656_v59 }
 0x241   :  { %704 = vst.msk [vmem:[%s1280_s8 + $0x8] sm:$0xff] %vm702_vm13, %v687_v55 }
 0x247   :  { %v664_v16 = vpop.permute.xlu2 %663 }
 0x248   :  { %677 = vst.msk [vmem:[%s1280_s8 + $0x28] sm:$0xff] %vm671_vm11, %v664_v16 }
 0x24f   :  { %v695_v60 = vpop.permute.xlu2 %694  ;;  %v660_v61 = vpop.permute.xlu0 %659 }
 0x250   :  { %708 = vst.msk [vmem:[%s1280_s8 + $0x28] sm:$0xff] %vm702_vm13, %v695_v60 }
 0x251   :  { %675 = vst.msk [vmem:[%s1280_s8 + $0x18] sm:$0xff] %vm671_vm11, %v660_v61 }
 0x257   :  { %v662_v62 = vpop.permute.xlu1 %661  ;;  %v691_v63 = vpop.permute.xlu0 %690 }
 0x258   :  { %676 = vst.msk [vmem:[%s1280_s8 + $0x20] sm:$0xff] %vm671_vm11, %v662_v62 }
 0x259   :  { %706 = vst.msk [vmem:[%s1280_s8 + $0x18] sm:$0xff] %vm702_vm13, %v691_v63 }
 0x25f   :  { %v693_v0 = vpop.permute.xlu1 %692 }
 0x260   :  { %707 = vst.msk [vmem:[%s1280_s8 + $0x20] sm:$0xff] %vm702_vm13, %v693_v0 }

</bundles_post_ra>
